<compile_context>
chip_gen: v7x
topology: tpu7x:2x2x1
jax: 0.10.0
libtpu: 0.0.40
codegen_flags: <defaults>
</compile_context>

<pallas_src>
import numpy as np
import jax
import jax.numpy as jnp
from jax import lax
from jax.experimental import pallas as pl
from jax.experimental.pallas import tpu as pltpu

DROPOUT_P = 0.7                    # nn.Dropout(0.7), training-mode semantics
KEEP_P = 1.0 - DROPOUT_P
INV_KEEP = np.float32(1.0 / KEEP_P)
KEEP_THRESH = np.int32(int(KEEP_P * (1 << 24)))   # keep iff 24-bit hash < thresh


def _i32(x):
    """Python int -> int32 constant with the same low-32 bit pattern."""
    x &= 0xFFFFFFFF
    if x >= 1 << 31:
        x -= 1 << 32
    return np.int32(x)


_MUL_ROW = _i32(0x9E3779B1)
_MUL_SEED = _i32(0x27D4EB2F)
_MIX1 = _i32(0x85EBCA6B)
_MIX2 = _i32(0xC2B2AE35)


def mlp_kernel(seed_ref, x_ref, w1_ref, b1_ref, w2_ref, b2_ref, w3_ref, b3_ref,
               o_ref):
    tb = x_ref.shape[0]
    x = x_ref[...]

    # ---- Dropout (p = 0.7), counter-based hash PRNG -------------------------
    # TODO(synk): RNG stream differs from torch.nn.Dropout (different generator),
    # but the Bernoulli(keep=0.3) + 1/(1-p) rescale semantics are identical.
    # (pltpu.prng_* was replaced by a portable integer hash: it has no CPU /
    # interpret lowering, and the hash keyed on the *global* row decorrelates
    # the mask across batch tiles.)
    row = lax.broadcasted_iota(jnp.int32, x.shape, 0) + pl.program_id(0) * tb
    col = lax.broadcasted_iota(jnp.int32, x.shape, 1)
    seed = seed_ref[0]
    h = col + row * _MUL_ROW + seed * _MUL_SEED
    h = h ^ ((h >> 16) & np.int32(0xFFFF))          # masked arith-shift == lshr
    h = h * _MIX1
    h = h ^ ((h >> 13) & np.int32(0x7FFFF))
    h = h * _MIX2
    h = h ^ ((h >> 16) & np.int32(0xFFFF))
    r24 = h & np.int32(0x00FFFFFF)                  # ~uniform in [0, 2^24)
    x = jnp.where(r24 < KEEP_THRESH, x * INV_KEEP, 0.0)

    # ---- fc: 3072 -> 256 (bf16 MXU inputs, f32 accumulation), ReLU ----------
    h1 = jnp.dot(x.astype(jnp.bfloat16), w1_ref[...],
                 preferred_element_type=jnp.float32) + b1_ref[...]
    h1 = jnp.maximum(h1, 0.0)

    # ---- fc2: 256 -> 128, ReLU ----------------------------------------------
    h2 = jnp.dot(h1.astype(jnp.bfloat16), w2_ref[...],
                 preferred_element_type=jnp.float32) + b2_ref[...]
    h2 = jnp.maximum(h2, 0.0)

    # ---- fc3: 128 -> 1 on the VPU/XLU (N=1 would waste the MXU), sigmoid ----
    logits = jnp.sum(h2 * w3_ref[...], axis=-1, keepdims=True) + b3_ref[...]
    o_ref[...] = 1.0 / (1.0 + jnp.exp(-logits))


def net_forward(x, params, seed, *, tb_max=512):
    """x: [B, 3072] float32 -> [B, 1] float32."""
    B, d_in = x.shape
    assert d_in == 3072
    w1, b1, w2, b2, w3, b3 = params

    # bf16 weights for the MXU path (f32 accumulation keeps precision); also
    # halves the resident VMEM footprint of the 3072x256 layer.
    w1 = w1.astype(jnp.bfloat16)
    w2 = w2.astype(jnp.bfloat16)
    w3_row = jnp.reshape(w3, (1, 128)).astype(jnp.float32)

    # Pad batch to a multiple of 8 (f32 sublane) and of the batch tile.
    bp = -(-B // 8) * 8
    tb = min(int(tb_max), bp)
    bp = -(-bp // tb) * tb
    if bp != B:
        x = jnp.pad(x, ((0, bp - B), (0, 0)))

    seed_arr = jnp.asarray(seed, dtype=jnp.int32).reshape((1,))

    grid_spec = pltpu.PrefetchScalarGridSpec(
        num_scalar_prefetch=1,                 # seed lands in SMEM
        grid=(bp // tb,),
        in_specs=[
            pl.BlockSpec((tb, 3072),  lambda i, s: (i, 0)),   # x  (streamed)
            pl.BlockSpec((3072, 256), lambda i, s: (0, 0)),   # w1 (resident)
            pl.BlockSpec((1, 256),    lambda i, s: (0, 0)),   # b1
            pl.BlockSpec((256, 128),  lambda i, s: (0, 0)),   # w2
            pl.BlockSpec((1, 128),    lambda i, s: (0, 0)),   # b2
            pl.BlockSpec((1, 128),    lambda i, s: (0, 0)),   # w3 (row form)
            pl.BlockSpec((1, 1),      lambda i, s: (0, 0)),   # b3
        ],
        out_specs=pl.BlockSpec((tb, 1), lambda i, s: (i, 0)),
    )

    out = pl.pallas_call(
        mlp_kernel,
        out_shape=jax.ShapeDtypeStruct((bp, 1), jnp.float32),
        grid_spec=grid_spec,
        compiler_params=pltpu.CompilerParams(
            dimension_semantics=("parallel",),      # batch axis -> megacore on v7x
            vmem_limit_bytes=32 * 1024 * 1024,      # safe on v5e/v6e/v7x
        ),
    )(seed_arr, x, w1, b1, w2, b2, w3_row, b3)
    return out[:B]


def init_params(key):
    """Deterministic init mimicking PyTorch nn.Linear (U(-1/sqrt(fan_in), +))."""
    def linear(key, fan_in, fan_out):
        kw, kb = jax.random.split(key)
        bound = 1.0 / jnp.sqrt(fan_in)
        w = jax.random.uniform(kw, (fan_in, fan_out), jnp.float32, -bound, bound)
        b = jax.random.uniform(kb, (1, fan_out), jnp.float32, -bound, bound)
        return w, b

    k1, k2, k3 = jax.random.split(key, 3)
    w1, b1 = linear(k1, 3072, 256)
    w2, b2 = linear(k2, 256, 128)
    w3, b3 = linear(k3, 128, 1)
    return w1, b1, w2, b2, w3, b3


if __name__ == "__main__":
    key = jax.random.PRNGKey(0)
    k_params, k_x = jax.random.split(key)

    B = 20   # ragged batch: exercises padding + a multi-step (grid=(3,)) pipeline
    x = jax.random.normal(k_x, (B, 3072), dtype=jnp.float32)
    params = init_params(k_params)
    seed = 0

    out = net_forward(x, params, seed, tb_max=8)   # small tile for the smoke test
    out = jax.block_until_ready(out)

    assert out.shape == (B, 1)
    assert bool(jnp.all((out >= 0.0) & (out <= 1.0)))   # sigmoid range sanity check
    assert bool(jnp.all(jnp.isfinite(out)))
    print("KERNEL_OK")
</pallas_src>

<mosaic_0001>
module attributes {stable_mosaic.version = 11 : i64} {
  func.func @mlp_kernel(%arg0: i32, %arg1: memref<1xi32, #tpu.memory_space<smem>>, %arg2: memref<8x3072xf32, #tpu.memory_space<vmem>>, %arg3: memref<3072x256xbf16, #tpu.memory_space<vmem>>, %arg4: memref<1x256xf32, #tpu.memory_space<vmem>>, %arg5: memref<256x128xbf16, #tpu.memory_space<vmem>>, %arg6: memref<1x128xf32, #tpu.memory_space<vmem>>, %arg7: memref<1x128xf32, #tpu.memory_space<vmem>>, %arg8: memref<1x1xf32, #tpu.memory_space<vmem>>, %arg9: memref<8x1xf32, #tpu.memory_space<vmem>>) attributes {dimension_semantics = [#tpu.dimension_semantics<parallel>], iteration_bounds = array<i64: 3>, scalar_prefetch = 1 : i64, scratch_operands = 0 : i64, tpu.core_type = #tpu.core_type<tc>, window_params = [{transform_indices = @transform_0, window_bounds = array<i64: 8, 3072>}, {pipeline_mode = #tpu.pipeline_mode<synchronous>, transform_indices = @transform_1, window_bounds = array<i64: 3072, 256>}, {pipeline_mode = #tpu.pipeline_mode<synchronous>, transform_indices = @transform_2, window_bounds = array<i64: 1, 256>}, {pipeline_mode = #tpu.pipeline_mode<synchronous>, transform_indices = @transform_3, window_bounds = array<i64: 256, 128>}, {pipeline_mode = #tpu.pipeline_mode<synchronous>, transform_indices = @transform_4, window_bounds = array<i64: 1, 128>}, {pipeline_mode = #tpu.pipeline_mode<synchronous>, transform_indices = @transform_5, window_bounds = array<i64: 1, 128>}, {pipeline_mode = #tpu.pipeline_mode<synchronous>, transform_indices = @transform_6, window_bounds = array<i64: 1, 1>}, {transform_indices = @transform_7, window_bounds = array<i64: 8, 1>}]} {
    %c0 = arith.constant 0 : index
    %c0_0 = arith.constant 0 : index
    %0 = vector.load %arg2[%c0, %c0_0] : memref<8x3072xf32, #tpu.memory_space<vmem>>, vector<8x3072xf32>
    %1 = tpu.iota {dimensions = array<i32: 0>} : vector<8x3072xi32>
    %c8_i32 = arith.constant 8 : i32
    %2 = arith.muli %arg0, %c8_i32 : i32
    %3 = vector.broadcast %2 : i32 to vector<8x3072xi32>
    %4 = arith.addi %1, %3 : vector<8x3072xi32>
    %5 = tpu.iota {dimensions = array<i32: 1>} : vector<8x3072xi32>
    %c0_1 = arith.constant 0 : index
    %6 = memref.load %arg1[%c0_1] : memref<1xi32, #tpu.memory_space<smem>>
    %c-1640531535_i32 = arith.constant -1640531535 : i32
    %7 = vector.broadcast %c-1640531535_i32 : i32 to vector<8x3072xi32>
    %8 = arith.muli %4, %7 : vector<8x3072xi32>
    %9 = arith.addi %5, %8 : vector<8x3072xi32>
    %c668265263_i32 = arith.constant 668265263 : i32
    %10 = arith.muli %6, %c668265263_i32 : i32
    %11 = vector.broadcast %10 : i32 to vector<8x3072xi32>
    %12 = arith.addi %9, %11 : vector<8x3072xi32>
    %c16_i32 = arith.constant 16 : i32
    %13 = vector.broadcast %c16_i32 : i32 to vector<8x3072xi32>
    %14 = arith.shrsi %12, %13 : vector<8x3072xi32>
    %c65535_i32 = arith.constant 65535 : i32
    %15 = vector.broadcast %c65535_i32 : i32 to vector<8x3072xi32>
    %16 = arith.andi %14, %15 : vector<8x3072xi32>
    %17 = arith.xori %12, %16 : vector<8x3072xi32>
    %c-2048144789_i32 = arith.constant -2048144789 : i32
    %18 = vector.broadcast %c-2048144789_i32 : i32 to vector<8x3072xi32>
    %19 = arith.muli %17, %18 : vector<8x3072xi32>
    %c13_i32 = arith.constant 13 : i32
    %20 = vector.broadcast %c13_i32 : i32 to vector<8x3072xi32>
    %21 = arith.shrsi %19, %20 : vector<8x3072xi32>
    %c524287_i32 = arith.constant 524287 : i32
    %22 = vector.broadcast %c524287_i32 : i32 to vector<8x3072xi32>
    %23 = arith.andi %21, %22 : vector<8x3072xi32>
    %24 = arith.xori %19, %23 : vector<8x3072xi32>
    %c-1028477387_i32 = arith.constant -1028477387 : i32
    %25 = vector.broadcast %c-1028477387_i32 : i32 to vector<8x3072xi32>
    %26 = arith.muli %24, %25 : vector<8x3072xi32>
    %c16_i32_2 = arith.constant 16 : i32
    %27 = vector.broadcast %c16_i32_2 : i32 to vector<8x3072xi32>
    %28 = arith.shrsi %26, %27 : vector<8x3072xi32>
    %c65535_i32_3 = arith.constant 65535 : i32
    %29 = vector.broadcast %c65535_i32_3 : i32 to vector<8x3072xi32>
    %30 = arith.andi %28, %29 : vector<8x3072xi32>
    %31 = arith.xori %26, %30 : vector<8x3072xi32>
    %c16777215_i32 = arith.constant 16777215 : i32
    %32 = vector.broadcast %c16777215_i32 : i32 to vector<8x3072xi32>
    %33 = arith.andi %31, %32 : vector<8x3072xi32>
    %c5033164_i32 = arith.constant 5033164 : i32
    %34 = vector.broadcast %c5033164_i32 : i32 to vector<8x3072xi32>
    %35 = arith.cmpi slt, %33, %34 : vector<8x3072xi32>
    %cst = arith.constant 3.33333325 : f32
    %36 = vector.broadcast %cst : f32 to vector<8x3072xf32>
    %37 = arith.mulf %0, %36 : vector<8x3072xf32>
    %cst_4 = arith.constant 0.000000e+00 : f32
    %38 = vector.broadcast %cst_4 : f32 to vector<8x3072xf32>
    %39 = arith.select %35, %37, %38 : vector<8x3072xi1>, vector<8x3072xf32>
    %40 = arith.truncf %39 : vector<8x3072xf32> to vector<8x3072xbf16>
    %c0_5 = arith.constant 0 : index
    %c0_6 = arith.constant 0 : index
    %41 = vector.load %arg3[%c0_5, %c0_6] : memref<3072x256xbf16, #tpu.memory_space<vmem>>, vector<3072x256xbf16>
    %cst_7 = arith.constant dense<0.000000e+00> : vector<8x256xf32>
    %42 = tpu.matmul %40, %41, %cst_7 {dimension_numbers = #tpu.dot_dimension_numbers<[1], [0], [0], [1], [0, 0, 1, 1], [], []>} : vector<8x3072xbf16>, vector<3072x256xbf16>, vector<8x256xf32> -> vector<8x256xf32>
    %c0_8 = arith.constant 0 : index
    %c0_9 = arith.constant 0 : index
    %43 = vector.load %arg4[%c0_8, %c0_9] : memref<1x256xf32, #tpu.memory_space<vmem>>, vector<1x256xf32>
    %44 = vector.broadcast %43 : vector<1x256xf32> to vector<8x256xf32>
    %45 = arith.addf %42, %44 : vector<8x256xf32>
    %cst_10 = arith.constant 0.000000e+00 : f32
    %46 = vector.broadcast %cst_10 : f32 to vector<8x256xf32>
    %47 = arith.maximumf %45, %46 : vector<8x256xf32>
    %48 = arith.truncf %47 : vector<8x256xf32> to vector<8x256xbf16>
    %c0_11 = arith.constant 0 : index
    %c0_12 = arith.constant 0 : index
    %49 = vector.load %arg5[%c0_11, %c0_12] : memref<256x128xbf16, #tpu.memory_space<vmem>>, vector<256x128xbf16>
    %cst_13 = arith.constant dense<0.000000e+00> : vector<8x128xf32>
    %50 = tpu.matmul %48, %49, %cst_13 {dimension_numbers = #tpu.dot_dimension_numbers<[1], [0], [0], [1], [0, 0, 1, 1], [], []>} : vector<8x256xbf16>, vector<256x128xbf16>, vector<8x128xf32> -> vector<8x128xf32>
    %c0_14 = arith.constant 0 : index
    %c0_15 = arith.constant 0 : index
    %51 = vector.load %arg6[%c0_14, %c0_15] : memref<1x128xf32, #tpu.memory_space<vmem>>, vector<1x128xf32>
    %52 = vector.broadcast %51 : vector<1x128xf32> to vector<8x128xf32>
    %53 = arith.addf %50, %52 : vector<8x128xf32>
    %cst_16 = arith.constant 0.000000e+00 : f32
    %54 = vector.broadcast %cst_16 : f32 to vector<8x128xf32>
    %55 = arith.maximumf %53, %54 : vector<8x128xf32>
    %c0_17 = arith.constant 0 : index
    %c0_18 = arith.constant 0 : index
    %56 = vector.load %arg7[%c0_17, %c0_18] : memref<1x128xf32, #tpu.memory_space<vmem>>, vector<1x128xf32>
    %57 = vector.broadcast %56 : vector<1x128xf32> to vector<8x128xf32>
    %58 = arith.mulf %55, %57 : vector<8x128xf32>
    %cst_19 = arith.constant dense<0.000000e+00> : vector<8xf32>
    %59 = vector.multi_reduction <add>, %58, %cst_19 [1] : vector<8x128xf32> to vector<8xf32>
    %60 = vector.shape_cast %59 : vector<8xf32> to vector<8x1xf32>
    %c0_20 = arith.constant 0 : index
    %c0_21 = arith.constant 0 : index
    %61 = vector.load %arg8[%c0_20, %c0_21] : memref<1x1xf32, #tpu.memory_space<vmem>>, vector<1x1xf32>
    %62 = vector.broadcast %61 : vector<1x1xf32> to vector<8x1xf32>
    %63 = arith.addf %60, %62 : vector<8x1xf32>
    %cst_22 = arith.constant 0.000000e+00 : f32
    %64 = vector.broadcast %cst_22 : f32 to vector<8x1xf32>
    %65 = arith.subf %64, %63 : vector<8x1xf32>
    %66 = math.exp %65 : vector<8x1xf32>
    %cst_23 = arith.constant 1.000000e+00 : f32
    %67 = vector.broadcast %cst_23 : f32 to vector<8x1xf32>
    %68 = arith.addf %67, %66 : vector<8x1xf32>
    %cst_24 = arith.constant 1.000000e+00 : f32
    %69 = vector.broadcast %cst_24 : f32 to vector<8x1xf32>
    %70 = arith.divf %69, %68 : vector<8x1xf32>
    %c0_25 = arith.constant 0 : index
    %c0_26 = arith.constant 0 : index
    %71 = vector.load %arg9[%c0_25, %c0_26] : memref<8x1xf32, #tpu.memory_space<vmem>>, vector<8x1xf32>
    tpu.vector_store %arg9[%c0_25, %c0_26], %70 {strides = array<i32>} : memref<8x1xf32, #tpu.memory_space<vmem>>, vector<8x1xf32>,
    return
  }
  func.func @transform_0(%arg0: i32, %arg1: memref<1xi32, #tpu.memory_space<smem>>) -> (i32, i32) {
    %c0_i32 = arith.constant 0 : i32
    %c0_i32_0 = arith.constant 0 : i32
    return %arg0, %c0_i32 : i32, i32
  }
  func.func @transform_1(%arg0: i32, %arg1: memref<1xi32, #tpu.memory_space<smem>>) -> (i32, i32) {
    %c0_i32 = arith.constant 0 : i32
    %c0_i32_0 = arith.constant 0 : i32
    %c0_i32_1 = arith.constant 0 : i32
    return %c0_i32, %c0_i32_0 : i32, i32
  }
  func.func @transform_2(%arg0: i32, %arg1: memref<1xi32, #tpu.memory_space<smem>>) -> (i32, i32) {
    %c0_i32 = arith.constant 0 : i32
    %c0_i32_0 = arith.constant 0 : i32
    %c0_i32_1 = arith.constant 0 : i32
    return %c0_i32, %c0_i32_0 : i32, i32
  }
  func.func @transform_3(%arg0: i32, %arg1: memref<1xi32, #tpu.memory_space<smem>>) -> (i32, i32) {
    %c0_i32 = arith.constant 0 : i32
    %c0_i32_0 = arith.constant 0 : i32
    %c0_i32_1 = arith.constant 0 : i32
    return %c0_i32, %c0_i32_0 : i32, i32
  }
  func.func @transform_4(%arg0: i32, %arg1: memref<1xi32, #tpu.memory_space<smem>>) -> (i32, i32) {
    %c0_i32 = arith.constant 0 : i32
    %c0_i32_0 = arith.constant 0 : i32
    %c0_i32_1 = arith.constant 0 : i32
    return %c0_i32, %c0_i32_0 : i32, i32
  }
  func.func @transform_5(%arg0: i32, %arg1: memref<1xi32, #tpu.memory_space<smem>>) -> (i32, i32) {
    %c0_i32 = arith.constant 0 : i32
    %c0_i32_0 = arith.constant 0 : i32
    %c0_i32_1 = arith.constant 0 : i32
    return %c0_i32, %c0_i32_0 : i32, i32
  }
  func.func @transform_6(%arg0: i32, %arg1: memref<1xi32, #tpu.memory_space<smem>>) -> (i32, i32) {
    %c0_i32 = arith.constant 0 : i32
    %c0_i32_0 = arith.constant 0 : i32
    %c0_i32_1 = arith.constant 0 : i32
    return %c0_i32, %c0_i32_0 : i32, i32
  }
  func.func @transform_7(%arg0: i32, %arg1: memref<1xi32, #tpu.memory_space<smem>>) -> (i32, i32) {
    %c0_i32 = arith.constant 0 : i32
    %c0_i32_0 = arith.constant 0 : i32
    return %arg0, %c0_i32 : i32, i32
  }
}

</mosaic_0001>

<bundles_post_ra>
// kernel: tpu_custom_call.1
= control target key start
LH: loop header
LB: loop body
LE: loop exit
PB: predicated region body
PF: predicated region fallthrough
CT: control target
= control target key end

     0   :  { %s6131_s0 = inlined_call_operand.<no memory space> [shape: s32[1], index: 0, kind: input, shape index: {}]   ;;  %s6132_s1 = inlined_call_operand.hbm [shape: f32[24,3072], index: 1, kind: input, shape index: {}]   ;;  %s6133_s2 = inlined_call_operand.hbm [shape: bf16[3072,256], index: 2, kind: input, shape index: {}]   ;;  %s6134_s3 = inlined_call_operand.hbm [shape: f32[1,256], index: 3, kind: input, shape index: {}]   ;;  %s6135_s4 = inlined_call_operand.hbm [shape: bf16[256,128], index: 4, kind: input, shape index: {}]   ;;  %s6136_s5 = inlined_call_operand.hbm [shape: f32[1,128], index: 5, kind: input, shape index: {}]   ;;  %s6137_s6 = inlined_call_operand.hbm [shape: f32[1,128], index: 6, kind: input, shape index: {}]   ;;  %s6138_s7 = inlined_call_operand.<no memory space> [shape: f32[1,1], index: 7, kind: input, shape index: {}]   ;;  %s6139_s8 = inlined_call_operand.vmem [shape: f32[24,1], index: 8, kind: output, shape index: {}]  }
   0x1   :  { %13 = sst [smem:[#allocation3]] %s6131_s0  ;;  %v14_v0 = vstv %s6138_s7 }
   0x2   :  { %15 = vst [vmem:[#allocation4] sm:$0x1] %v14_v0 }
   0x3   :  { %16 = vsyncpa [#allocation6], 0 }
   0x4   :  { %18 = vsyncpa [#allocation6 + $0x1], 0 }
   0x5   :  { %19 = vsyncpa [#allocation8], 0 }
   0x6   :  { %20 = vsyncpa [#allocation11], 0 }
   0x7   :  { %21 = vsyncpa [#allocation14], 0  ;;  %s5588_s9 = smov 0   ;;  %s5590_s10 = smov 0  }
   0x8   :  { %s5592_s11 = smov 0   ;;  %s5594_s12 = smov 0  }
   0x9 LB: > { %s5527_s0 = smov [#allocation7]   ;;  %s5609_s13 = sadd.s32 4294967295, %s5525_s12   ;;  %s5525_s12 = sphi %s5594_s12, %s6202_s12   ;;  %s5521_s11 = sphi %s5592_s11, %s6201_s11   ;;  %s5517_s10 = sphi %s5590_s10, %s6200_s10   ;;  %s5513_s9 = sphi %s5588_s9, %s6199_s9  }
   0xa   : > { %s222_s7 = sshll.u32 %s5527_s0, 4  ;;  %p3985_p0 = scmp.ge.s32.totalorder %s5525_s12, 1  ;;  %s5614_s7 = int_to_ptr.vmem [resolvable:$true] %s222_s7 }
   0xb   : > { %p6140_p1 = scmp.eq.s32.totalorder %s5609_s13, 0  ;;  %p210_p2 = scmp.lt.s32.totalorder %s5525_s12, 4 }
   0xc   : > { %s5528_s15 = smov [#allocation10]   ;;  %s5529_s18 = smov [#allocation9]  }
   0xd   : > { %p5616_p3 = pnand %p3985_p0, %p210_p2  ;;  %s246_s16 = sshll.u32 %s5528_s15, 4  ;;  %s5628_s16 = int_to_ptr.vmem [resolvable:$true] %s246_s16 }
   0xe   : > { %s5630_s19 = sshll.u32 %s5529_s18, 4  ;;  %s5309_s22 = scalar_lea.hbm %s6133_s2, 49152  ;;  %s237_s19 = int_to_ptr.vmem [resolvable:$true] %s5630_s19 }
   0xf   : > { %s6142_s14 = scalar_select %p5616_p3, 1, 0 }
  0x10   : > { %p4641_p4 = pneg %p5616_p3  ;;  %p5310_p6 = scmp.ne.s32.totalorder %s6133_s2, %s5309_s22 }
  0x11   : > { %p5316_p10 = scmp.lt.u32.totalorder %s5309_s22, %s6133_s2 }
  0x12   : > { %p5624_p5 = pnand %p4641_p4, %p6140_p1 }
  0x14   : > { %p5640_p7 = pneg %p5624_p5 }
  0x16   : > { %p5312_p8 = pnand %p5640_p7, %p5310_p6 }
  0x18   : > { %p5313_p9 = pneg %p5312_p8 }
  0x1a   : > { %p5318_p11 = pnand %p5316_p10, %p5313_p9 }
  0x1c   : > { %5321 = shalt.err (!%p5318_p11)
}
  0x1d   : > { %s5322_s28 = scalar_lea.vmem %s5614_s7, 49152  ;;  %p5330_p2 = scmp.lt.s32.totalorder %s5614_s7, %s5614_s7 }
  0x1e   : > { %p5323_p12 = scmp.ne.s32.totalorder %s5614_s7, %s5322_s28  ;;  %p5331_p4 = scmp.lt.s32.totalorder %s5322_s28, %s5322_s28 }
  0x20   : > { %p5325_p13 = pnand %p5323_p12, %p5640_p7  ;;  %p5332_p6 = por %p5331_p4, %p5330_p2 }
  0x22   : > { %p5326_p0 = pneg %p5325_p13 }
  0x24   : > { %p5333_p8 = pnand %p5332_p6, %p5326_p0 }
  0x26   : > { %5336 = shalt.err (!%p5333_p8)
}
  0x27   : > { %s5530_s29 = smov 128   ;;  %s5531_s30 = smov 8  }
  0x28   : > { %4644 = dma.hbm_to_vmem [thread:$0]  (!%p5624_p5), %s6133_s2, 49152, %s5614_s7, [#allocation8], %s5530_s29, %s5530_s29, %s5531_s30  }
  0x29   : > { %s5337_s21 = scalar_lea.hbm %s6135_s4, 2048 }
  0x2a   : > { %p5338_p9 = scmp.ne.s32.totalorder %s6135_s4, %s5337_s21  ;;  %p5344_p12 = scmp.lt.u32.totalorder %s5337_s21, %s6135_s4 }
  0x2c   : > { %p5340_p10 = pnand %p5338_p9, %p5640_p7 }
  0x2e   : > { %p5341_p11 = pneg %p5340_p10 }
  0x30   : > { %p5346_p13 = pnand %p5344_p12, %p5341_p11 }
  0x32   : > { %5349 = shalt.err (!%p5346_p13)
}
  0x33   : > { %s5350_s7 = scalar_lea.vmem %s5628_s16, 2048  ;;  %p5358_p6 = scmp.lt.s32.totalorder %s5628_s16, %s5628_s16 }
  0x34   : > { %p5351_p0 = scmp.ne.s32.totalorder %s5628_s16, %s5350_s7  ;;  %p5359_p8 = scmp.lt.s32.totalorder %s5350_s7, %s5350_s7 }
  0x36   : > { %p5353_p2 = pnand %p5351_p0, %p5640_p7  ;;  %p5360_p9 = por %p5359_p8, %p5358_p6 }
  0x38   : > { %p5354_p4 = pneg %p5353_p2 }
  0x3a   : > { %p5361_p10 = pnand %p5360_p9, %p5354_p4 }
  0x3c   : > { %5364 = shalt.err (!%p5361_p10)
}
  0x3d   : > { %s5532_s27 = smov 64   ;;  %s5533_s28 = smov 4  }
  0x3e   : > { %4650 = dma.hbm_to_vmem [thread:$0]  (!%p5624_p5), %s6135_s4, 2048, %s5628_s16, [#allocation11], %s5532_s27, %s5532_s27, %s5533_s28  }
  0x3f   : > { %s5365_s18 = scalar_lea.hbm %s6134_s3, 32 }
  0x40   : > { %p5366_p11 = scmp.ne.s32.totalorder %s6134_s3, %s5365_s18  ;;  %p5372_p0 = scmp.lt.u32.totalorder %s5365_s18, %s6134_s3 }
  0x42   : > { %p5368_p12 = pnand %p5366_p11, %p5640_p7 }
  0x44   : > { %p5369_p13 = pneg %p5368_p12 }
  0x46   : > { %p5374_p2 = pnand %p5372_p0, %p5369_p13 }
  0x48   : > { %5377 = shalt.err (!%p5374_p2)
}
  0x49   : > { %s5378_s24 = scalar_lea.vmem %s237_s19, 32  ;;  %p5386_p9 = scmp.lt.s32.totalorder %s237_s19, %s237_s19 }
  0x4a   : > { %p5379_p4 = scmp.ne.s32.totalorder %s237_s19, %s5378_s24  ;;  %p5387_p10 = scmp.lt.s32.totalorder %s5378_s24, %s5378_s24 }
  0x4c   : > { %p5381_p6 = pnand %p5379_p4, %p5640_p7  ;;  %p5388_p1 = por %p5387_p10, %p5386_p9 }
  0x4e   : > { %p5382_p8 = pneg %p5381_p6 }
  0x50   : > { %p5389_p3 = pnand %p5388_p1, %p5382_p8 }
  0x52   : > { %5392 = shalt.err (!%p5389_p3)
}
  0x53   : > { %4647 = dma.hbm_to_vmem [thread:$0]  (!%p5624_p5), %s6134_s3, 32, %s237_s19, [#allocation8]  }
  0x54   : > { %s5534_s7 = smov [#allocation12]   ;;  %s5535_s28 = smov [#allocation13]  }
  0x55   : > { %s260_s27 = sshll.u32 %s5534_s7, 4  ;;  %s271_s29 = sshll.u32 %s5535_s28, 4  ;;  %s261_s27 = int_to_ptr.vmem [resolvable:$true] %s260_s27  ;;  %s272_s29 = int_to_ptr.vmem [resolvable:$true] %s271_s29 }
  0x56   : > { %s5393_s15 = scalar_lea.hbm %s6136_s5, 16 }
  0x57   : > { %p5394_p1 = scmp.ne.s32.totalorder %s6136_s5, %s5393_s15  ;;  %p5400_p12 = scmp.lt.u32.totalorder %s5393_s15, %s6136_s5 }
  0x59   : > { %p5396_p3 = pnand %p5394_p1, %p5640_p7 }
  0x5b   : > { %p5397_p11 = pneg %p5396_p3 }
  0x5d   : > { %p5402_p13 = pnand %p5400_p12, %p5397_p11 }
  0x5f   : > { %5405 = shalt.err (!%p5402_p13)
}
  0x60   : > { %s5406_s19 = scalar_lea.vmem %s261_s27, 16  ;;  %s5413_s23 = scalar_lea.vmem %s261_s27, 32 }
  0x61   : > { %p5407_p0 = scmp.ne.s32.totalorder %s261_s27, %s5406_s19  ;;  %p5414_p6 = scmp.lt.s32.totalorder %s261_s27, %s261_s27 }
  0x62   : > { %p5415_p8 = scmp.lt.s32.totalorder %s5413_s23, %s5406_s19 }
  0x63   : > { %p5409_p2 = pnand %p5407_p0, %p5640_p7 }
  0x64   : > { %p5416_p9 = por %p5415_p8, %p5414_p6 }
  0x65   : > { %p5410_p4 = pneg %p5409_p2 }
  0x67   : > { %p5417_p10 = pnand %p5416_p9, %p5410_p4 }
  0x69   : > { %5420 = shalt.err (!%p5417_p10)
}
  0x6a   : > { %4653 = dma.hbm_to_vmem [thread:$0]  (!%p5624_p5), %s6136_s5, 16, %s261_s27, [#allocation11]  }
  0x6b   : > { %s5421_s28 = scalar_lea.hbm %s6137_s6, 16 }
  0x6c   : > { %p5422_p1 = scmp.ne.s32.totalorder %s6137_s6, %s5421_s28  ;;  %p5428_p12 = scmp.lt.u32.totalorder %s5421_s28, %s6137_s6 }
  0x6e   : > { %p5424_p3 = pnand %p5422_p1, %p5640_p7 }
  0x70   : > { %p5425_p11 = pneg %p5424_p3 }
  0x72   : > { %p5430_p13 = pnand %p5428_p12, %p5425_p11 }
  0x74   : > { %5433 = shalt.err (!%p5430_p13)
}
  0x75   : > { %s5434_s20 = scalar_lea.vmem %s272_s29, 16  ;;  %s5441_s27 = scalar_lea.vmem %s272_s29, 32 }
  0x76   : > { %p5435_p0 = scmp.ne.s32.totalorder %s272_s29, %s5434_s20  ;;  %p5442_p6 = scmp.lt.s32.totalorder %s272_s29, %s272_s29 }
  0x77   : > { %p5443_p8 = scmp.lt.s32.totalorder %s5441_s27, %s5434_s20 }
  0x78   : > { %p5437_p2 = pnand %p5435_p0, %p5640_p7 }
  0x79   : > { %p5444_p9 = por %p5443_p8, %p5442_p6 }
  0x7a   : > { %p5438_p4 = pneg %p5437_p2 }
  0x7c   : > { %p5445_p10 = pnand %p5444_p9, %p5438_p4 }
  0x7e   : > { %5448 = shalt.err (!%p5445_p10)
}
  0x7f   : > { %4656 = dma.hbm_to_vmem [thread:$0]  (!%p5624_p5), %s6137_s6, 16, %s272_s29, [#allocation14]  }
  0x80   : > { %s5740_s25 = sadd.s32 1, %s5525_s12   ;;  %s34_s19 = sadd.s32 1, %s5521_s11 }
  0x81   : > { %s31_s17 = ssub.s32 %s5525_s12, %s5740_s25  ;;  %p41_p1 = scmp.ne.s32.totalorder %s5521_s11, %s5517_s10 }
  0x82   : > { %p32_p7 = scmp.eq.s32.totalorder %s31_s17, 0  ;;  %p42_p3 = scmp.eq.s32.totalorder %s5525_s12, 0 }
  0x83   : > { %p47_p11 = scmp.ne.s32.totalorder %s5517_s10, %s5513_s9  ;;  %p6145_p13 = scmp.eq.s32.totalorder %s5609_s13, 0 }
  0x84   : > { %s5751_s23 = scalar_select %p32_p7, %s5521_s11, %s34_s19  }
  0x85   : > { %p43_p12 = por %p42_p3, %p41_p1  ;;  %p5755_p0 = por %p6145_p13, %p47_p11 }
  0x86   : > { %p4666_p2 = scmp.lt.s32.totalorder %s5525_s12, 3  ;;  %s285_s16 = sand.u32 1, %s5521_s11  }
  0x87   : > { %s4616_s29 = smul.u32 192, %s285_s16  ;;  %s5454_s21 = scalar_lea.hbm %s6132_s1, 9216 }
  0x88   : > { %s4617_s26 = smul.u32 3072, %s5525_s12  ;;  %p5762_p5 = pnand %p4666_p2, %p43_p12 }
  0x89   : > { %s289_s0 = scalar_lea.vmem [#allocation5], %s4616_s29  ;;  %s286_s12 = scalar_lea.sflag [#allocation6], %s285_s16 }
  0x8a   : > { %s5769_s9 = scalar_lea.hbm %s6132_s1, %s4617_s26  ;;  %s297_s15 = sshll.u32 %s289_s0, 4  ;;  %s5771_s15 = int_to_ptr.vmem [resolvable:$true] %s297_s15 }
  0x8b   : > { %s5449_s18 = scalar_lea.hbm %s5769_s9, 3072  ;;  %p5451_p6 = pneg %p5762_p5 }
  0x8c   : > { %p5450_p4 = scmp.ne.s32.totalorder %s5769_s9, %s5449_s18  ;;  %p5455_p10 = scmp.lt.u32.totalorder %s5769_s9, %s6132_s1 }
  0x8d   : > { %p5456_p7 = scmp.lt.u32.totalorder %s5454_s21, %s5449_s18  ;;  %p5458_p3 = scmp.lt.u32.totalorder %s5449_s18, %s5769_s9 }
  0x8e   : > { %p5452_p8 = pnand %p5451_p6, %p5450_p4 }
  0x8f   : > { %p5457_p1 = por %p5456_p7, %p5455_p10 }
  0x90   : > { %p5453_p9 = pneg %p5452_p8 }
  0x91   : > { %p5459_p11 = por %p5458_p3, %p5457_p1 }
  0x93   : > { %p5460_p12 = pnand %p5459_p11, %p5453_p9 }
  0x95   : > { %5463 = shalt.err (!%p5460_p12)
}
  0x96   : > { %s5464_s19 = scalar_lea.vmem %s5771_s15, 3072  ;;  %s5536_s16 = smov [#allocation5]  }
  0x97   : > { %p5465_p13 = scmp.ne.s32.totalorder %s5771_s15, %s5464_s19  ;;  %s5469_s29 = sshll.u32 %s5536_s16, 4  ;;  %s5470_s29 = int_to_ptr.vmem [resolvable:$false] %s5469_s29 }
  0x98   : > { %s5471_s26 = scalar_lea.vmem %s5470_s29, 6144  ;;  %p5472_p8 = scmp.lt.s32.totalorder %s5771_s15, %s5470_s29 }
  0x99   : > { %p5467_p2 = pnand %p5465_p13, %p5451_p6  ;;  %p5473_p10 = scmp.lt.s32.totalorder %s5471_s26, %s5464_s19 }
  0x9b   : > { %p5468_p4 = pneg %p5467_p2  ;;  %p5474_p7 = por %p5473_p10, %p5472_p8 }
  0x9d   : > { %p5475_p1 = pnand %p5474_p7, %p5468_p4 }
  0x9f   : > { %5478 = shalt.err (!%p5475_p1)
}
  0xa0   : > { %4660 = dma.hbm_to_vmem [thread:$0]  (!%p5762_p5), %s5769_s9, 3072, %s5771_s15, %s286_s12  }
  0xa1   : > { %p6148_p9 = scmp.ne.s32.totalorder %s6142_s14, 0 }
  0xa2   : > { %s308_s28 = sand.u32 (!%p6148_p9), 1, %s5517_s10  }
  0xa3   : > { %306 = sbr.rel (%p6148_p9) target bundleno = 1182 (0x49e), region = 48  ;;  %s309_s0 = scalar_lea.sflag (!%p6148_p9), [#allocation6], %s308_s28 }
  0xa4   : > { %s4618_s30 = smul.u32 (!%p6148_p9), 192, %s308_s28 }
  0xa6   : > { %s5801_s18 = scalar_lea.vmem (!%p6148_p9), [#allocation5], %s4618_s30 }
  0xaa   : > { %5496 = dma.done.wait (%p5755_p0), %s309_s0, 3072  }
  0xab   : > { %5498 = vsyncadd (%p5755_p0), %s309_s0, 4294964224  ;;  %p6149_p6 = scmp.eq.s32.totalorder %s5609_s13, 0 }
  0xad   : > { %5500 = dma.done.wait (%p6149_p6), [#allocation8], 49184   ;;  %p6150_p5 = pmov %p6149_p6 }
  0xaf   : > { %5502 = vsyncadd (%p6150_p5), [#allocation8], 4294918112  ;;  %p6151_p3 = pmov %p6150_p5 }
  0xb1   : > { %5504 = dma.done.wait (%p6151_p3), [#allocation11], 2064   ;;  %p6152_p11 = pmov %p6151_p3 }
  0xb2   : > { %p6153_p12 = pmov %p6151_p3 }
  0xb3   : > { %5506 = vsyncadd (%p6152_p11), [#allocation11], 4294965232 }
  0xb4   : > { %5508 = dma.done.wait (%p6153_p12), [#allocation14], 16   ;;  %p6154_p13 = pmov %p6151_p3 }
  0xb5   : > { %v391_v1 = vlaneseq  ;;  %s4000_s14 = sshll.u32 %s5609_s13, 3  ;;  %s421_s24 = sld [smem:[#allocation3]]  ;;  %v4713_v9 = vld [vmem:[#allocation7 + $0x4] ss:$8 sps:$4 sm:$0xff]   ;;  %v4717_v13 = vld [vmem:[#allocation7] ss:$8 sps:$4 sm:$0xff]  }
  0xb6   : > { %5510 = vsyncadd (%p6154_p13), [#allocation14], 4294967280  ;;  %v394_v2 = vstv %s4000_s14  ;;  %v4715_v10 = vld [vmem:[#allocation7 + $0x604] ss:$8 sps:$4 sm:$0xff]   ;;  %3173 = vmatprep.subr.bf16.mxu1 %v4713_v9  ;;  %v4718_v14 = vld [vmem:[#allocation7 + $0x600] ss:$8 sps:$4 sm:$0xff]  }
  0xb7   : > { %v5820_v3 = vshrl.u32 %v391_v1, 7  ;;  %v5822_v4 = vand.u32 127, %v391_v1  ;;  %3419 = vmatprep.subr.bf16.mxu0 %v4715_v10  ;;  %v4719_v16 = vld [vmem:[#allocation7 + $0x14] ss:$8 sps:$4 sm:$0xff]   ;;  %3174 = vmatpush1.bf16.msra.mxu1 %v4717_v13  ;;  %v4723_v19 = vld [vmem:[#allocation7 + $0x10] ss:$8 sps:$4 sm:$0xff]  }
  0xb8   : > { %3420 = vmatpush1.bf16.msra.mxu0 %v4718_v14  ;;  %v4721_v18 = vld [vmem:[#allocation7 + $0x614] ss:$8 sps:$4 sm:$0xff]   ;;  %3175 = vmatprep.subr.bf16.mxu1 %v4719_v16  ;;  %v4724_v21 = vld [vmem:[#allocation7 + $0x610] ss:$8 sps:$4 sm:$0xff]   ;;  %v4725_v23 = vld [vmem:[#allocation7 + $0x24] ss:$8 sps:$4 sm:$0xff]  }
  0xb9   : > { %v395_v5 = vadd.s32 %v394_v2, %v5820_v3  ;;  %v398_v6 = vadd.s32 128, %v5822_v4  ;;  %v410_v7 = vadd.s32 1664, %v5822_v4  ;;  %3421 = vmatprep.subr.bf16.mxu0 %v4721_v18  ;;  %v4727_v24 = vld [vmem:[#allocation7 + $0x624] ss:$8 sps:$4 sm:$0xff]   ;;  %v4729_v25 = vld [vmem:[#allocation7 + $0x20] ss:$8 sps:$4 sm:$0xff]  }
  0xba   : > { %v4730_v26 = vld [vmem:[#allocation7 + $0x620] ss:$8 sps:$4 sm:$0xff]   ;;  %v4731_v27 = vld [vmem:[#allocation7 + $0x34] ss:$8 sps:$4 sm:$0xff]   ;;  %v409_v31 = vadd.s32 1536, %v5822_v4  ;;  %p362_p0 = scmp.lt.s32.totalorder %s5609_s13, 2 }
  0xbb   : > { %v5827_v8 = vmul.u32 2654435761, %v395_v5  ;;  %s447_s7 = smul.u32 668265263, %s421_s24  ;;  %3176 = vmatpush1.bf16.msra.mxu1 %v4723_v19  ;;  %v4733_v29 = vld [vmem:[#allocation7 + $0x634] ss:$8 sps:$4 sm:$0xff]  }
  0xbc   : > { %3422 = vmatpush1.bf16.msra.mxu0 %v4724_v21  ;;  %3177 = vmatprep.subr.bf16.mxu1 %v4725_v23  ;;  %v4735_v32 = vld [vmem:[#allocation7 + $0x30] ss:$8 sps:$4 sm:$0xff]   ;;  %v4737_v35 = vld [vmem:[#allocation7 + $0x44] ss:$8 sps:$4 sm:$0xff]   ;;  %v4741_v40 = vld [vmem:[#allocation7 + $0x40] ss:$8 sps:$4 sm:$0xff]  }
  0xbd   : > { %v424_v11 = vadd.s32 %v5827_v8, %v398_v6  ;;  %v436_v12 = vadd.s32 %v5827_v8, %v410_v7  ;;  %v5831_v15 = vstv %s447_s7  ;;  %3423 = vmatprep.subr.bf16.mxu0 %v4727_v24  ;;  %v423_v33 = vadd.s32 %v5827_v8, %v5822_v4  ;;  %v4736_v34 = vld [vmem:[#allocation7 + $0x630] ss:$8 sps:$4 sm:$0xff]   ;;  %v4739_v37 = vld [vmem:[#allocation7 + $0x644] ss:$8 sps:$4 sm:$0xff]   ;;  %v4742_v41 = vld [vmem:[#allocation7 + $0x640] ss:$8 sps:$4 sm:$0xff]  }
  0xbe   : > { %v435_v39 = vadd.s32 %v5827_v8, %v409_v31  ;;  %v4743_v43 = vld [vmem:[#allocation7 + $0x54] ss:$8 sps:$4 sm:$0xff]   ;;  %v4747_v48 = vld [vmem:[#allocation7 + $0x50] ss:$8 sps:$4 sm:$0xff]   ;;  %v4749_v51 = vld [vmem:[#allocation7 + $0x64] ss:$8 sps:$4 sm:$0xff]  }
  0xbf   : > { %v450_v17 = vadd.s32 %v5831_v15, %v424_v11  ;;  %v462_v20 = vadd.s32 %v5831_v15, %v436_v12  ;;  %3178 = vmatpush1.bf16.msra.mxu1 %v4729_v25  ;;  %v449_v42 = vadd.s32 %v5831_v15, %v423_v33  ;;  %v4745_v45 = vld [vmem:[#allocation7 + $0x654] ss:$8 sps:$4 sm:$0xff]   ;;  %v4748_v50 = vld [vmem:[#allocation7 + $0x650] ss:$8 sps:$4 sm:$0xff]   ;;  %v4751_v53 = vld [vmem:[#allocation7 + $0x664] ss:$8 sps:$4 sm:$0xff]  }
  0xc0   : > { %3424 = vmatpush1.bf16.msra.mxu0 %v4730_v26  ;;  %3179 = vmatprep.subr.bf16.mxu1 %v4731_v27  ;;  %v461_v47 = vadd.s32 %v5831_v15, %v435_v39  ;;  %v4753_v56 = vld [vmem:[#allocation7 + $0x60] ss:$8 sps:$4 sm:$0xff]   ;;  %v4755_v59 = vld [vmem:[#allocation7 + $0x74] ss:$8 sps:$4 sm:$0xff]   ;;  %v4759_v63 = vld [vmem:[#allocation7 + $0x70] ss:$8 sps:$4 sm:$0xff]  }
  0xc1   : > { %v4002_v22 = vshrl.u32 %v450_v17, 16  ;;  %v4014_v28 = vshrl.u32 %v462_v20, 16  ;;  %3425 = vmatprep.subr.bf16.mxu0 %v4733_v29  ;;  %v4001_v49 = vshrl.u32 %v449_v42, 16  ;;  %v4754_v57 = vld [vmem:[#allocation7 + $0x660] ss:$8 sps:$4 sm:$0xff]   ;;  %v400_v25 = vadd.s32 384, %v5822_v4 }
  0xc2   : > { %v4013_v55 = vshrl.u32 %v461_v47, 16  ;;  %v4757_v61 = vld [vmem:[#allocation7 + $0x674] ss:$8 sps:$4 sm:$0xff]   ;;  %v4760_v1 = vld [vmem:[#allocation7 + $0x670] ss:$8 sps:$4 sm:$0xff]   ;;  %v412_v29 = vadd.s32 1920, %v5822_v4 }
  0xc3   : > { %v522_v30 = vxor.u32 %v4002_v22, %v450_v17  ;;  %v534_v36 = vxor.u32 %v4014_v28, %v462_v20  ;;  %3180 = vmatpush1.bf16.msra.mxu1 %v4735_v32  ;;  %v521_v58 = vxor.u32 %v4001_v49, %v449_v42  ;;  %v4761_v5 = vld [vmem:[#allocation7 + $0x84] ss:$8 sps:$4 sm:$0xff]   ;;  %v4765_v11 = vld [vmem:[#allocation7 + $0x80] ss:$8 sps:$4 sm:$0xff]   ;;  %v4767_v14 = vld [vmem:[#allocation7 + $0x94] ss:$8 sps:$4 sm:$0xff]  }
  0xc4   : > { %3426 = vmatpush1.bf16.msra.mxu0 %v4736_v34  ;;  %3181 = vmatprep.subr.bf16.mxu1 %v4737_v35  ;;  %v533_v0 = vxor.u32 %v4013_v55, %v461_v47  ;;  %v4763_v7 = vld [vmem:[#allocation7 + $0x684] ss:$8 sps:$4 sm:$0xff]   ;;  %v4766_v12 = vld [vmem:[#allocation7 + $0x680] ss:$8 sps:$4 sm:$0xff]   ;;  %v4769_v17 = vld [vmem:[#allocation7 + $0x694] ss:$8 sps:$4 sm:$0xff]  }
  0xc5   : > { %v546_v38 = vmul.u32 2246822507, %v522_v30  ;;  %v558_v44 = vmul.u32 2246822507, %v534_v36  ;;  %3427 = vmatprep.subr.bf16.mxu0 %v4739_v37  ;;  %v4771_v20 = vld [vmem:[#allocation7 + $0x90] ss:$8 sps:$4 sm:$0xff]   ;;  %v426_v37 = vadd.s32 %v5827_v8, %v400_v25 }
  0xc6   : > { %v545_v2 = vmul.u32 2246822507, %v521_v58  ;;  %v557_v10 = vmul.u32 2246822507, %v533_v0  ;;  %v4772_v22 = vld [vmem:[#allocation7 + $0x690] ss:$8 sps:$4 sm:$0xff]  }
  0xc7   : > { %v4026_v46 = vshrl.u32 %v546_v38, 13  ;;  %3182 = vmatpush1.bf16.msra.mxu1 %v4741_v40  ;;  %v4038_v52 = vshrl.u32 %v558_v44, 13  ;;  %v4773_v23 = vld [vmem:[#allocation7 + $0xa4] ss:$8 sps:$4 sm:$0xff]   ;;  %v4777_v30 = vld [vmem:[#allocation7 + $0xa0] ss:$8 sps:$4 sm:$0xff]  }
  0xc8   : > { %3428 = vmatpush1.bf16.msra.mxu0 %v4742_v41  ;;  %3183 = vmatprep.subr.bf16.mxu1 %v4743_v43  ;;  %v4025_v13 = vshrl.u32 %v545_v2, 13  ;;  %v4037_v19 = vshrl.u32 %v557_v10, 13  ;;  %v4775_v26 = vld [vmem:[#allocation7 + $0x6a4] ss:$8 sps:$4 sm:$0xff]   ;;  %v4778_v31 = vld [vmem:[#allocation7 + $0x6a0] ss:$8 sps:$4 sm:$0xff]   ;;  %v438_v43 = vadd.s32 %v5827_v8, %v412_v29 }
  0xc9   : > { %3429 = vmatprep.subr.bf16.mxu0 %v4745_v45  ;;  %v618_v54 = vxor.u32 %v4026_v46, %v546_v38  ;;  %v630_v60 = vxor.u32 %v4038_v52, %v558_v44  ;;  %v4779_v33 = vld [vmem:[#allocation7 + $0xb4] ss:$8 sps:$4 sm:$0xff]   ;;  %v4783_v38 = vld [vmem:[#allocation7 + $0xb0] ss:$8 sps:$4 sm:$0xff]   ;;  %v368_v39 = vld [vmem:[%s5801_s18 + $0x8] sm:$0xff]  ;;  %v399_v36 = vadd.s32 256, %v5822_v4 }
  0xca   : > { %v617_v21 = vxor.u32 %v4025_v13, %v545_v2  ;;  %v629_v28 = vxor.u32 %v4037_v19, %v557_v10  ;;  %v4781_v35 = vld [vmem:[#allocation7 + $0x6b4] ss:$8 sps:$4 sm:$0xff]   ;;  %v4784_v41 = vld [vmem:[#allocation7 + $0x6b0] ss:$8 sps:$4 sm:$0xff]   ;;  %v786_v42 = vmul.f32 3.3333333, %v368_v39  ;;  %v464_v55 = vadd.s32 %v5831_v15, %v438_v43 }
  0xcb   : > { %3184 = vmatpush1.bf16.msra.mxu1 %v4747_v48  ;;  %v642_v62 = vmul.u32 3266489909, %v618_v54  ;;  %v654_v6 = vmul.u32 3266489909, %v630_v60  ;;  %v4785_v44 = vld [vmem:[#allocation7 + $0xc4] ss:$8 sps:$4 sm:$0xff]   ;;  %v425_v43 = vadd.s32 %v5827_v8, %v399_v36 }
  0xcc   : > { %3430 = vmatpush1.bf16.msra.mxu0 %v4748_v50  ;;  %3185 = vmatprep.subr.bf16.mxu1 %v4749_v51  ;;  %v641_v32 = vmul.u32 3266489909, %v617_v21  ;;  %v653_v40 = vmul.u32 3266489909, %v629_v28  ;;  %v380_v45 = vld [vmem:[%s5801_s18 + $0x68] sm:$0xff]  ;;  %v4458_v49 = vpack.c.bf16 %v786_v42, %v786_v42  ;;  %v452_v51 = vadd.s32 %v5831_v15, %v426_v37  ;;  %s6204_s13 = smov (!%p362_p0, %s5609_s13), 2 }
  0xcd   : > { %3431 = vmatprep.subr.bf16.mxu0 %v4751_v53  ;;  %v4050_v9 = vshrl.u32 %v642_v62, 16  ;;  %v4062_v16 = vshrl.u32 %v654_v6, 16  ;;  %v4787_v48 = vld [vmem:[#allocation7 + $0x6c4] ss:$8 sps:$4 sm:$0xff]   ;;  %v798_v50 = vmul.f32 3.3333333, %v380_v45 }
  0xce   : > { %v4049_v47 = vshrl.u32 %v641_v32, 16  ;;  %v4061_v52 = vshrl.u32 %v653_v40, 16  ;;  %v4789_v53 = vld [vmem:[#allocation7 + $0xc0] ss:$8 sps:$4 sm:$0xff]   ;;  %v4004_v60 = vshrl.u32 %v452_v51, 16  ;;  %v4016_v0 = vshrl.u32 %v464_v55, 16 }
  0xcf   : > { %3186 = vmatpush1.bf16.msra.mxu1 %v4753_v56  ;;  %v714_v18 = vxor.u32 %v4050_v9, %v642_v62  ;;  %v726_v24 = vxor.u32 %v4062_v16, %v654_v6  ;;  %v4494_v54 = vpack.c.bf16 %v798_v50, %v798_v50  ;;  %v4790_v56 = vld [vmem:[#allocation7 + $0x6c0] ss:$8 sps:$4 sm:$0xff]   ;;  %v4795_v62 = vld [vmem:[#allocation7 + $0xd0] ss:$8 sps:$4 sm:$0xff]   ;;  %v4823_v39 = vld [vmem:[#allocation7 + $0x124] ss:$8 sps:$4 sm:$0xff]  }
  0xd0   : > { %3432 = vmatpush1.bf16.msra.mxu0 %v4754_v57  ;;  %3187 = vmatprep.subr.bf16.mxu1 %v4755_v59  ;;  %v4791_v57 = vld [vmem:[#allocation7 + $0xd4] ss:$8 sps:$4 sm:$0xff]   ;;  %v713_v58 = vxor.u32 %v4049_v47, %v641_v32  ;;  %v524_v6 = vxor.u32 %v4004_v60, %v452_v51  ;;  %v4802_v9 = vld [vmem:[#allocation7 + $0x6e0] ss:$8 sps:$4 sm:$0xff]   ;;  %v536_v16 = vxor.u32 %v4016_v0, %v464_v55  ;;  %v4807_v19 = vld [vmem:[#allocation7 + $0xf0] ss:$8 sps:$4 sm:$0xff]  }
  0xd1   : > { %3433 = vmatprep.subr.bf16.mxu0 %v4757_v61  ;;  %v738_v27 = vand.u32 16777215, %v714_v18  ;;  %v750_v34 = vand.u32 16777215, %v726_v24  ;;  %v4793_v59 = vld [vmem:[#allocation7 + $0x6d4] ss:$8 sps:$4 sm:$0xff]   ;;  %v725_v61 = vxor.u32 %v4061_v52, %v653_v40  ;;  %v451_v51 = vadd.s32 %v5831_v15, %v425_v43 }
  0xd2   : > { %v737_v2 = vand.u32 16777215, %v713_v58  ;;  %v548_v18 = vmul.u32 2246822507, %v524_v6  ;;  %v4811_v24 = vld [vmem:[#allocation7 + $0x104] ss:$8 sps:$4 sm:$0xff]  }
  0xd3   : > { %3188 = vmatpush1.bf16.msra.mxu1 %v4759_v63  ;;  %vm5843_vm0 = vcmp.lt.s32.totalorder %v738_v27, 5033164  ;;  %vm5854_vm2 = vcmp.lt.s32.totalorder %v750_v34, 5033164  ;;  %v4796_v63 = vld [vmem:[#allocation7 + $0x6d0] ss:$8 sps:$4 sm:$0xff]  }
  0xd4   : > { %3434 = vmatpush1.bf16.msra.mxu0 %v4760_v1  ;;  %3189 = vmatprep.subr.bf16.mxu1 %v4761_v5  ;;  %vm4457_vm1 = vmpackc.low %vm5843_vm0, %vm5843_vm0  ;;  %v4797_v1 = vld [vmem:[#allocation7 + $0xe4] ss:$8 sps:$4 sm:$0xff]   ;;  %v749_v10 = vand.u32 16777215, %v725_v61  ;;  %vm5864_vm4 = vcmp.lt.s32.totalorder %v737_v2, 5033164 }
  0xd5   : > { %3435 = vmatprep.subr.bf16.mxu0 %v4763_v7  ;;  %4459 = vmatprep.mubr.msk.bf16.mxu1 %vm4457_vm1, %v4458_v49  ;;  %vm4493_vm3 = vmpackc.low %vm5854_vm2, %vm5854_vm2  ;;  %v4799_v5 = vld [vmem:[#allocation7 + $0x6e4] ss:$8 sps:$4 sm:$0xff]   ;;  %v4801_v7 = vld [vmem:[#allocation7 + $0xe0] ss:$8 sps:$4 sm:$0xff]   ;;  %v560_v25 = vmul.u32 2246822507, %v536_v16 }
  0xd6   : > { %4495 = vmatprep.mubr.msk.bf16.mxu0 %vm4493_vm3, %v4494_v54  ;;  %vm5869_vm5 = vcmp.lt.s32.totalorder %v749_v10, 5033164  ;;  %v4809_v27 = vld [vmem:[#allocation7 + $0x100] ss:$8 sps:$4 sm:$0xff]   ;;  %vm4460_vm6 = vmpackc.low %vm5864_vm4, %vm5864_vm4  ;;  %v4028_v28 = vshrl.u32 %v548_v18, 13  ;;  %v411_v49 = vadd.s32 1792, %v5822_v4 }
  0xd7   : > { %3190 = vmatpush1.bf16.msra.mxu1 %v4765_v11  ;;  %v4803_v11 = vld [vmem:[#allocation7 + $0xf4] ss:$8 sps:$4 sm:$0xff]   ;;  %v4812_v29 = vld [vmem:[#allocation7 + $0x700] ss:$8 sps:$4 sm:$0xff]   ;;  %vm4496_vm7 = vmpackc.low %vm5869_vm5, %vm5869_vm5  ;;  %v402_v6 = vadd.s32 640, %v5822_v4  ;;  %s3999_s9 = sshll.u32 %s6204_s13, 3 }
  0xd8   : > { %3436 = vmatpush1.bf16.msra.mxu0 %v4766_v12  ;;  %3191 = vmatprep.subr.bf16.mxu1 %v4767_v14  ;;  %v367_v12 = vld [vmem:[%s5801_s18] sm:$0xff]  ;;  %v4817_v32 = vld [vmem:[#allocation7 + $0x114] ss:$8 sps:$4 sm:$0xff]   ;;  %v4815_v37 = vld [vmem:[#allocation7 + $0x110] ss:$8 sps:$4 sm:$0xff]   ;;  %s365_s20 = scalar_lea.vmem %s6139_s8, %s3999_s9 }
  0xd9   : > { %3437 = vmatprep.subr.bf16.mxu0 %v4769_v17  ;;  %v379_v14 = vld [vmem:[%s5801_s18 + $0x60] sm:$0xff]  ;;  %v4805_v17 = vld [vmem:[#allocation7 + $0x6f4] ss:$8 sps:$4 sm:$0xff]   ;;  %v4827_v52 = vld [vmem:[#allocation7 + $0x130] ss:$8 sps:$4 sm:$0xff]  }
  0xda   : > { %v4820_v34 = vld [vmem:[#allocation7 + $0x714] ss:$8 sps:$4 sm:$0xff]   ;;  %v4824_v45 = vld [vmem:[#allocation7 + $0x720] ss:$8 sps:$4 sm:$0xff]   ;;  %v4835_v54 = vld [vmem:[#allocation7 + $0x144] ss:$8 sps:$4 sm:$0xff]  }
  0xdb   : > { %3192 = vmatpush1.bf16.msra.mxu1 %v4771_v20  ;;  %v4808_v20 = vld [vmem:[#allocation7 + $0x6f0] ss:$8 sps:$4 sm:$0xff]   ;;  %v4829_v46 = vld [vmem:[#allocation7 + $0x134] ss:$8 sps:$4 sm:$0xff]   ;;  %v4833_v60 = vld [vmem:[#allocation7 + $0x140] ss:$8 sps:$4 sm:$0xff]  }
  0xdc   : > { %3438 = vmatpush1.bf16.msra.mxu0 %v4772_v22  ;;  %3193 = vmatprep.subr.bf16.mxu1 %v4773_v23  ;;  %v785_v22 = vmul.f32 3.3333333, %v367_v12  ;;  %v797_v23 = vmul.f32 3.3333333, %v379_v14  ;;  %v4836_v61 = vld [vmem:[#allocation7 + $0x740] ss:$8 sps:$4 sm:$0xff]  }
  0xdd   : > { %3439 = vmatprep.subr.bf16.mxu0 %v4775_v26  ;;  %v4814_v26 = vld [vmem:[#allocation7 + $0x704] ss:$8 sps:$4 sm:$0xff]   ;;  %v4844_v0 = vld [vmem:[#allocation7 + $0x754] ss:$8 sps:$4 sm:$0xff]  }
  0xde   : > { %v4847_v10 = vld [vmem:[#allocation7 + $0x164] ss:$8 sps:$4 sm:$0xff]   ;;  %v4853_v21 = vld [vmem:[#allocation7 + $0x174] ss:$8 sps:$4 sm:$0xff]  }
  0xdf   : > { %3194 = vmatpush1.bf16.msra.mxu1 %v4777_v30  ;;  %v4461_v30 = vpack.c.bf16 %v785_v22, %v785_v22  ;;  %v4850_v12 = vld [vmem:[#allocation7 + $0x764] ss:$8 sps:$4 sm:$0xff]   ;;  %v370_v22 = vld [vmem:[%s5801_s18 + $0x18] sm:$0xff] }
  0xe0   : > { %3440 = vmatpush1.bf16.msra.mxu0 %v4778_v31  ;;  %3195 = vmatprep.subr.bf16.mxu1 %v4779_v33  ;;  %v4497_v31 = vpack.c.bf16 %v797_v23, %v797_v23  ;;  %v4040_v33 = vshrl.u32 %v560_v25, 13  ;;  %v4865_v43 = vld [vmem:[#allocation7 + $0x194] ss:$8 sps:$4 sm:$0xff]  }
  0xe1   : > { %3441 = vmatprep.subr.bf16.mxu0 %v4781_v35  ;;  %v620_v35 = vxor.u32 %v4028_v28, %v548_v18  ;;  %v4845_v18 = vld [vmem:[#allocation7 + $0x160] ss:$8 sps:$4 sm:$0xff]   ;;  %v4889_v14 = vld [vmem:[#allocation7 + $0x1d4] ss:$8 sps:$4 sm:$0xff]  }
  0xe2   : > { %v632_v40 = vxor.u32 %v4040_v33, %v560_v25  ;;  %v788_v25 = vmul.f32 3.3333333, %v370_v22  ;;  %v4854_v33 = vld [vmem:[#allocation7 + $0x770] ss:$8 sps:$4 sm:$0xff]   ;;  %v4895_v22 = vld [vmem:[#allocation7 + $0x1e4] ss:$8 sps:$4 sm:$0xff]  }
  0xe3   : > { %3196 = vmatpush1.bf16.msra.mxu1 %v4783_v38  ;;  %v4818_v38 = vld [vmem:[#allocation7 + $0x710] ss:$8 sps:$4 sm:$0xff]   ;;  %v644_v42 = vmul.u32 3266489909, %v620_v35  ;;  %v4940_v23 = vld [vmem:[#allocation7 + $0x854] ss:$8 sps:$4 sm:$0xff]  }
  0xe4   : > { %3442 = vmatpush1.bf16.msra.mxu0 %v4784_v41  ;;  %3197 = vmatprep.subr.bf16.mxu1 %v4785_v44  ;;  %v4826_v41 = vld [vmem:[#allocation7 + $0x724] ss:$8 sps:$4 sm:$0xff]   ;;  %v4821_v44 = vld [vmem:[#allocation7 + $0x120] ss:$8 sps:$4 sm:$0xff]   ;;  %v656_v47 = vmul.u32 3266489909, %v632_v40 }
  0xe5   : > { %3443 = vmatprep.subr.bf16.mxu0 %v4787_v48  ;;  %v4832_v48 = vld [vmem:[#allocation7 + $0x734] ss:$8 sps:$4 sm:$0xff]   ;;  %v4052_v50 = vshrl.u32 %v644_v42, 16 }
  0xe6   : > { %v4064_v55 = vshrl.u32 %v656_v47, 16 }
  0xe7   : > { %3198 = vmatpush1.bf16.msra.mxu1 %v4789_v53  ;;  %v4830_v53 = vld [vmem:[#allocation7 + $0x730] ss:$8 sps:$4 sm:$0xff]   ;;  %v716_v58 = vxor.u32 %v4052_v50, %v644_v42  ;;  %v4860_v42 = vld [vmem:[#allocation7 + $0x780] ss:$8 sps:$4 sm:$0xff]  }
  0xe8   : > { %3444 = vmatpush1.bf16.msra.mxu0 %v4790_v56  ;;  %3199 = vmatprep.subr.bf16.mxu1 %v4791_v57  ;;  %v4838_v56 = vld [vmem:[#allocation7 + $0x744] ss:$8 sps:$4 sm:$0xff]   ;;  %v437_v57 = vadd.s32 %v5827_v8, %v411_v49  ;;  %v4863_v49 = vld [vmem:[#allocation7 + $0x190] ss:$8 sps:$4 sm:$0xff]  }
  0xe9   : > { %3445 = vmatprep.subr.bf16.mxu0 %v4793_v59  ;;  %v4003_v59 = vshrl.u32 %v451_v51, 16  ;;  %v740_v2 = vand.u32 16777215, %v716_v58  ;;  %v4866_v50 = vld [vmem:[#allocation7 + $0x790] ss:$8 sps:$4 sm:$0xff]  }
  0xea   : > { %v4872_v58 = vld [vmem:[#allocation7 + $0x7a0] ss:$8 sps:$4 sm:$0xff]  }
  0xeb   : > { %3200 = vmatpush1.bf16.msra.mxu1 %v4795_v62  ;;  %v4841_v62 = vld [vmem:[#allocation7 + $0x154] ss:$8 sps:$4 sm:$0xff]   ;;  %vm5886_vm8 = vcmp.lt.s32.totalorder %v740_v2, 5033164  ;;  %v4878_v2 = vld [vmem:[#allocation7 + $0x7b0] ss:$8 sps:$4 sm:$0xff]  }
  0xec   : > { %3446 = vmatpush1.bf16.msra.mxu0 %v4796_v63  ;;  %3201 = vmatprep.subr.bf16.mxu1 %v4797_v1  ;;  %v728_v63 = vxor.u32 %v4064_v55, %v656_v47  ;;  %v463_v1 = vadd.s32 %v5831_v15, %v437_v57  ;;  %vm4463_vm10 = vmpackc.low %vm5886_vm8, %vm5886_vm8  ;;  %v4869_v57 = vld [vmem:[#allocation7 + $0x1a0] ss:$8 sps:$4 sm:$0xff]  }
  0xed   : > { %3447 = vmatprep.subr.bf16.mxu0 %v4799_v5  ;;  %v523_v5 = vxor.u32 %v4003_v59, %v451_v51  ;;  %v4871_v51 = vld [vmem:[#allocation7 + $0x1a4] ss:$8 sps:$4 sm:$0xff]   ;;  %v4877_v59 = vld [vmem:[#allocation7 + $0x1b4] ss:$8 sps:$4 sm:$0xff]  }
  0xee   : > { %v4015_v13 = vshrl.u32 %v463_v1, 16 }
  0xef   : > { %3202 = vmatpush1.bf16.msra.mxu1 %v4801_v7  ;;  %v4839_v7 = vld [vmem:[#allocation7 + $0x150] ss:$8 sps:$4 sm:$0xff]   ;;  %v547_v16 = vmul.u32 2246822507, %v523_v5  ;;  %v4883_v5 = vld [vmem:[#allocation7 + $0x1c4] ss:$8 sps:$4 sm:$0xff]  }
  0xf0   : > { %3448 = vmatpush1.bf16.msra.mxu0 %v4802_v9  ;;  %3203 = vmatprep.subr.bf16.mxu1 %v4803_v11  ;;  %v4842_v9 = vld [vmem:[#allocation7 + $0x750] ss:$8 sps:$4 sm:$0xff]   ;;  %v752_v11 = vand.u32 16777215, %v728_v63 }
  0xf1   : > { %3449 = vmatprep.subr.bf16.mxu0 %v4805_v17  ;;  %v428_v17 = vadd.s32 %v5827_v8, %v402_v6 }
  0xf2   : > { %vm5893_vm9 = vcmp.lt.s32.totalorder %v752_v11, 5033164 }
  0xf3   : > { %3204 = vmatpush1.bf16.msra.mxu1 %v4807_v19  ;;  %v4848_v19 = vld [vmem:[#allocation7 + $0x760] ss:$8 sps:$4 sm:$0xff]   ;;  %vm4499_vm11 = vmpackc.low %vm5893_vm9, %vm5893_vm9 }
  0xf4   : > { %3450 = vmatpush1.bf16.msra.mxu0 %v4808_v20  ;;  %3214 = vmatprep.subr.bf16.mxu1 %v4811_v24  ;;  %v414_v20 = vadd.s32 2176, %v5822_v4  ;;  %v4856_v24 = vld [vmem:[#allocation7 + $0x774] ss:$8 sps:$4 sm:$0xff]  }
  0xf5   : > { %3460 = vmatprep.subr.bf16.mxu0 %v4814_v26  ;;  %v382_v26 = vld [vmem:[%s5801_s18 + $0x78] sm:$0xff] }
  0xf6   : > { %4462 = vmatmul.mubr.msk.bf16.vlgmr.msra.gmra.mrb[0].mxu1 %vm4460_vm6, %v4461_v30  ;;  %v800_v28 = vmul.f32 3.3333333, %v382_v26  ;;  %v454_v30 = vadd.s32 %v5831_v15, %v428_v17  ;;  %v440_v36 = vadd.s32 %v5827_v8, %v414_v20  ;;  %v4892_v17 = vld [vmem:[#allocation7 + $0x7d4] ss:$8 sps:$4 sm:$0xff]   ;;  %v4887_v20 = vld [vmem:[#allocation7 + $0x1d0] ss:$8 sps:$4 sm:$0xff]  }
  0xf7   : > { %4498 = vmatmul.mubr.msk.bf16.vlgmr.msra.gmra.mrb[0].mxu0 %vm4496_vm7, %v4497_v31  ;;  %3215 = vmatpush1.bf16.msra.mxu1 %v4809_v27  ;;  %v535_v27 = vxor.u32 %v4015_v13, %v463_v1  ;;  %v4464_v31 = vpack.c.bf16 %v788_v25, %v788_v25  ;;  %v4875_v1 = vld [vmem:[#allocation7 + $0x1b0] ss:$8 sps:$4 sm:$0xff]   ;;  %v4884_v13 = vld [vmem:[#allocation7 + $0x7c0] ss:$8 sps:$4 sm:$0xff]   ;;  %v4898_v25 = vld [vmem:[#allocation7 + $0x7e4] ss:$8 sps:$4 sm:$0xff]  }
  0xf8   : > { %3461 = vmatpush1.bf16.msra.mxu0 %v4812_v29  ;;  %3216 = vmatprep.subr.bf16.mxu1 %v4817_v32  ;;  %v4027_v29 = vshrl.u32 %v547_v16, 13  ;;  %v4851_v32 = vld [vmem:[#allocation7 + $0x170] ss:$8 sps:$4 sm:$0xff]   ;;  %v4500_v35 = vpack.c.bf16 %v800_v28, %v800_v28  ;;  %v4006_v40 = vshrl.u32 %v454_v30, 16  ;;  %v4896_v28 = vld [vmem:[#allocation7 + $0x7e0] ss:$8 sps:$4 sm:$0xff]  }
  0xf9   : > { %3462 = vmatprep.subr.bf16.mxu0 %v4820_v34  ;;  %v4859_v34 = vld [vmem:[#allocation7 + $0x184] ss:$8 sps:$4 sm:$0xff]   ;;  %4465 = vmatprep.mubr.msk.bf16.mxu1 %vm4463_vm10, %v4464_v31 }
  0xfa   : > { %4501 = vmatprep.mubr.msk.bf16.mxu0 %vm4499_vm11, %v4500_v35  ;;  %v4941_v35 = vld [vmem:[#allocation7 + $0x260] ss:$8 sps:$4 sm:$0xff]  }
  0xfb   : > { %3217 = vmatpush1.bf16.msra.mxu1 %v4815_v37  ;;  %v4862_v37 = vld [vmem:[#allocation7 + $0x784] ss:$8 sps:$4 sm:$0xff]  }
  0xfc   : > { %3463 = vmatpush1.bf16.msra.mxu0 %v4818_v38  ;;  %3218 = vmatprep.subr.bf16.mxu1 %v4823_v39  ;;  %v559_v38 = vmul.u32 2246822507, %v535_v27  ;;  %v619_v39 = vxor.u32 %v4027_v29, %v547_v16  ;;  %v4893_v27 = vld [vmem:[#allocation7 + $0x1e0] ss:$8 sps:$4 sm:$0xff]   ;;  %v4901_v29 = vld [vmem:[#allocation7 + $0x1f4] ss:$8 sps:$4 sm:$0xff]  }
  0xfd   : > { %3464 = vmatprep.subr.bf16.mxu0 %v4826_v41  ;;  %v4857_v41 = vld [vmem:[#allocation7 + $0x180] ss:$8 sps:$4 sm:$0xff]  }
  0xfe   : > { %v643_v47 = vmul.u32 3266489909, %v619_v39 }
  0xff   : > { %3219 = vmatpush1.bf16.msra.mxu1 %v4821_v44  ;;  %v466_v44 = vadd.s32 %v5831_v15, %v440_v36  ;;  %v4899_v36 = vld [vmem:[#allocation7 + $0x1f0] ss:$8 sps:$4 sm:$0xff]  }
 0x100   : > { %3465 = vmatpush1.bf16.msra.mxu0 %v4824_v45  ;;  %3220 = vmatprep.subr.bf16.mxu1 %v4829_v46  ;;  %v4868_v45 = vld [vmem:[#allocation7 + $0x794] ss:$8 sps:$4 sm:$0xff]   ;;  %v4039_v46 = vshrl.u32 %v559_v38, 13  ;;  %v4051_v55 = vshrl.u32 %v643_v47, 16 }
 0x101   : > { %3466 = vmatprep.subr.bf16.mxu0 %v4832_v48  ;;  %v526_v48 = vxor.u32 %v4006_v40, %v454_v30  ;;  %v369_v30 = vld [vmem:[%s5801_s18 + $0x10] sm:$0xff] }
 0x102   : > { %v715_v63 = vxor.u32 %v4051_v55, %v643_v47 }
 0x103   : > { %3221 = vmatpush1.bf16.msra.mxu1 %v4827_v52  ;;  %v4018_v52 = vshrl.u32 %v466_v44, 16 }
 0x104   : > { %3467 = vmatpush1.bf16.msra.mxu0 %v4830_v53  ;;  %3222 = vmatprep.subr.bf16.mxu1 %v4835_v54  ;;  %v4874_v53 = vld [vmem:[#allocation7 + $0x7a4] ss:$8 sps:$4 sm:$0xff]   ;;  %v631_v54 = vxor.u32 %v4039_v46, %v559_v38  ;;  %v787_v38 = vmul.f32 3.3333333, %v369_v30 }
 0x105   : > { %3468 = vmatprep.subr.bf16.mxu0 %v4838_v56  ;;  %v550_v56 = vmul.u32 2246822507, %v526_v48 }
 0x106   : > { %v4467_v46 = vpack.c.bf16 %v787_v38, %v787_v38 }
 0x107   : > { %3223 = vmatpush1.bf16.msra.mxu1 %v4833_v60  ;;  %v538_v60 = vxor.u32 %v4018_v52, %v466_v44  ;;  %v4905_v44 = vld [vmem:[#allocation7 + $0x200] ss:$8 sps:$4 sm:$0xff]   ;;  %v4911_v52 = vld [vmem:[#allocation7 + $0x210] ss:$8 sps:$4 sm:$0xff]  }
 0x108   : > { %3469 = vmatpush1.bf16.msra.mxu0 %v4836_v61  ;;  %3224 = vmatprep.subr.bf16.mxu1 %v4841_v62  ;;  %v4880_v61 = vld [vmem:[#allocation7 + $0x7b4] ss:$8 sps:$4 sm:$0xff]   ;;  %v655_v62 = vmul.u32 3266489909, %v631_v54  ;;  %v4914_v54 = vld [vmem:[#allocation7 + $0x810] ss:$8 sps:$4 sm:$0xff]  }
 0x109   : > { %3470 = vmatprep.subr.bf16.mxu0 %v4844_v0  ;;  %v4030_v0 = vshrl.u32 %v550_v56, 13  ;;  %v562_v6 = vmul.u32 2246822507, %v538_v60  ;;  %v4917_v60 = vld [vmem:[#allocation7 + $0x220] ss:$8 sps:$4 sm:$0xff]  }
 0x10b   : > { %3225 = vmatpush1.bf16.msra.mxu1 %v4839_v7  ;;  %v4886_v7 = vld [vmem:[#allocation7 + $0x7c4] ss:$8 sps:$4 sm:$0xff]   ;;  %v622_v11 = vxor.u32 %v4030_v0, %v550_v56  ;;  %v4042_v16 = vshrl.u32 %v562_v6, 13 }
 0x10c   : > { %3471 = vmatpush1.bf16.msra.mxu0 %v4842_v9  ;;  %3226 = vmatprep.subr.bf16.mxu1 %v4847_v10  ;;  %v4063_v9 = vshrl.u32 %v655_v62, 16  ;;  %v739_v10 = vand.u32 16777215, %v715_v63  ;;  %v4919_v56 = vld [vmem:[#allocation7 + $0x224] ss:$8 sps:$4 sm:$0xff]  }
 0x10d   : > { %3472 = vmatprep.subr.bf16.mxu0 %v4850_v12  ;;  %v4881_v12 = vld [vmem:[#allocation7 + $0x1c0] ss:$8 sps:$4 sm:$0xff]  }
 0x10e   : > { %vm5912_vm12 = vcmp.lt.s32.totalorder %v739_v10, 5033164  ;;  %v384_v63 = vld [vmem:[%s5801_s18 + $0x88] sm:$0xff] }
 0x10f   : > { %3227 = vmatpush1.bf16.msra.mxu1 %v4845_v18  ;;  %v727_v18 = vxor.u32 %v4063_v9, %v655_v62  ;;  %vm4466_vm14 = vmpackc.low %vm5912_vm12, %vm5912_vm12  ;;  %v4920_v62 = vld [vmem:[#allocation7 + $0x820] ss:$8 sps:$4 sm:$0xff]   ;;  %v4923_v9 = vld [vmem:[#allocation7 + $0x230] ss:$8 sps:$4 sm:$0xff]  }
 0x110   : > { %3473 = vmatpush1.bf16.msra.mxu0 %v4848_v19  ;;  %3228 = vmatprep.subr.bf16.mxu1 %v4853_v21  ;;  %v646_v19 = vmul.u32 3266489909, %v622_v11  ;;  %v4890_v21 = vld [vmem:[#allocation7 + $0x7d0] ss:$8 sps:$4 sm:$0xff]  }
 0x111   : > { %3474 = vmatprep.subr.bf16.mxu0 %v4856_v24  ;;  %v634_v24 = vxor.u32 %v4042_v16, %v562_v6  ;;  %v751_v26 = vand.u32 16777215, %v727_v18  ;;  %v4928_v6 = vld [vmem:[#allocation7 + $0x834] ss:$8 sps:$4 sm:$0xff]   ;;  %v404_v18 = vadd.s32 896, %v5822_v4 }
 0x112   : > { %v4054_v31 = vshrl.u32 %v646_v19, 16 }
 0x113   : > { %3229 = vmatpush1.bf16.msra.mxu1 %v4851_v32  ;;  %v381_v32 = vld [vmem:[%s5801_s18 + $0x70] sm:$0xff]  ;;  %vm5918_vm13 = vcmp.lt.s32.totalorder %v751_v26, 5033164  ;;  %v430_v26 = vadd.s32 %v5827_v8, %v404_v18 }
 0x114   : > { %3475 = vmatpush1.bf16.msra.mxu0 %v4854_v33  ;;  %3230 = vmatprep.subr.bf16.mxu1 %v4859_v34  ;;  %v658_v33 = vmul.u32 3266489909, %v634_v24  ;;  %v4904_v34 = vld [vmem:[#allocation7 + $0x7f4] ss:$8 sps:$4 sm:$0xff]   ;;  %v799_v39 = vmul.f32 3.3333333, %v381_v32  ;;  %v718_v40 = vxor.u32 %v4054_v31, %v646_v19  ;;  %vm4502_vm15 = vmpackc.low %vm5918_vm13, %vm5918_vm13 }
 0x115   : > { %3476 = vmatprep.subr.bf16.mxu0 %v4862_v37  ;;  %v4902_v37 = vld [vmem:[#allocation7 + $0x7f0] ss:$8 sps:$4 sm:$0xff]   ;;  %v4929_v19 = vld [vmem:[#allocation7 + $0x240] ss:$8 sps:$4 sm:$0xff]   ;;  %v4946_v31 = vld [vmem:[#allocation7 + $0x864] ss:$8 sps:$4 sm:$0xff]  }
 0x116   : > { %v4503_v47 = vpack.c.bf16 %v799_v39, %v799_v39  ;;  %v742_v48 = vand.u32 16777215, %v718_v40  ;;  %v4952_v39 = vld [vmem:[#allocation7 + $0x874] ss:$8 sps:$4 sm:$0xff]  }
 0x117   : > { %3231 = vmatpush1.bf16.msra.mxu1 %v4857_v41  ;;  %v4907_v41 = vld [vmem:[#allocation7 + $0x204] ss:$8 sps:$4 sm:$0xff]  }
 0x118   : > { %3477 = vmatpush1.bf16.msra.mxu0 %v4860_v42  ;;  %3232 = vmatprep.subr.bf16.mxu1 %v4865_v43  ;;  %v4066_v42 = vshrl.u32 %v658_v33, 16  ;;  %v4910_v43 = vld [vmem:[#allocation7 + $0x804] ss:$8 sps:$4 sm:$0xff]   ;;  %vm5928_vm0 = vcmp.lt.s32.totalorder %v742_v48, 5033164 }
 0x119   : > { %3478 = vmatprep.subr.bf16.mxu0 %v4868_v45  ;;  %v4908_v45 = vld [vmem:[#allocation7 + $0x800] ss:$8 sps:$4 sm:$0xff]   ;;  %vm4469_vm1 = vmpackc.low %vm5928_vm0, %vm5928_vm0 }
 0x11b   : > { %3233 = vmatpush1.bf16.msra.mxu1 %v4863_v49  ;;  %v4913_v49 = vld [vmem:[#allocation7 + $0x214] ss:$8 sps:$4 sm:$0xff]  }
 0x11c   : > { %3479 = vmatpush1.bf16.msra.mxu0 %v4866_v50  ;;  %3234 = vmatprep.subr.bf16.mxu1 %v4871_v51  ;;  %v730_v50 = vxor.u32 %v4066_v42, %v658_v33  ;;  %v4916_v51 = vld [vmem:[#allocation7 + $0x814] ss:$8 sps:$4 sm:$0xff]  }
 0x11d   : > { %3480 = vmatprep.subr.bf16.mxu0 %v4874_v53  ;;  %v4961_v53 = vld [vmem:[#allocation7 + $0x294] ss:$8 sps:$4 sm:$0xff]  }
 0x11e   : > { %v754_v55 = vand.u32 16777215, %v730_v50 }
 0x11f   : > { %3235 = vmatpush1.bf16.msra.mxu1 %v4869_v57  ;;  %v4922_v57 = vld [vmem:[#allocation7 + $0x824] ss:$8 sps:$4 sm:$0xff]  }
 0x120   : > { %3481 = vmatpush1.bf16.msra.mxu0 %v4872_v58  ;;  %3236 = vmatprep.subr.bf16.mxu1 %v4877_v59  ;;  %v372_v58 = vld [vmem:[%s5801_s18 + $0x28] sm:$0xff]  ;;  %v401_v59 = vadd.s32 512, %v5822_v4  ;;  %vm5938_vm2 = vcmp.lt.s32.totalorder %v754_v55, 5033164  ;;  %v4964_v55 = vld [vmem:[#allocation7 + $0x894] ss:$8 sps:$4 sm:$0xff]  }
 0x121   : > { %3482 = vmatprep.subr.bf16.mxu0 %v4880_v61  ;;  %v790_v61 = vmul.f32 3.3333333, %v372_v58  ;;  %vm4505_vm3 = vmpackc.low %vm5938_vm2, %vm5938_vm2 }
 0x122   : > { %v427_v11 = vadd.s32 %v5827_v8, %v401_v59  ;;  %v4959_v59 = vld [vmem:[#allocation7 + $0x290] ss:$8 sps:$4 sm:$0xff]  }
 0x123   : > { %3237 = vmatpush1.bf16.msra.mxu1 %v4875_v1  ;;  %v4470_v0 = vpack.c.bf16 %v790_v61, %v790_v61  ;;  %v4967_v61 = vld [vmem:[#allocation7 + $0x2a4] ss:$8 sps:$4 sm:$0xff]  }
 0x124   : > { %3483 = vmatpush1.bf16.msra.mxu0 %v4878_v2  ;;  %3238 = vmatprep.subr.bf16.mxu1 %v4883_v5  ;;  %v802_v2 = vmul.f32 3.3333333, %v384_v63  ;;  %v4925_v5 = vld [vmem:[#allocation7 + $0x234] ss:$8 sps:$4 sm:$0xff]   ;;  %v4970_v63 = vld [vmem:[#allocation7 + $0x8a4] ss:$8 sps:$4 sm:$0xff]  }
 0x125   : > { %3484 = vmatprep.subr.bf16.mxu0 %v4886_v7  ;;  %v413_v7 = vadd.s32 2048, %v5822_v4 }
 0x126   : > { %v4506_v10 = vpack.c.bf16 %v802_v2, %v802_v2 }
 0x127   : > { %3239 = vmatpush1.bf16.msra.mxu1 %v4881_v12  ;;  %v4926_v12 = vld [vmem:[#allocation7 + $0x830] ss:$8 sps:$4 sm:$0xff]   ;;  %v439_v16 = vadd.s32 %v5827_v8, %v413_v7  ;;  %v4973_v7 = vld [vmem:[#allocation7 + $0x2b4] ss:$8 sps:$4 sm:$0xff]  }
 0x128   : > { %3485 = vmatpush1.bf16.msra.mxu0 %v4884_v13  ;;  %3240 = vmatprep.subr.bf16.mxu1 %v4889_v14  ;;  %v4931_v13 = vld [vmem:[#allocation7 + $0x244] ss:$8 sps:$4 sm:$0xff]  }
 0x129   : > { %3486 = vmatprep.subr.bf16.mxu0 %v4892_v17  ;;  %v4934_v14 = vld [vmem:[#allocation7 + $0x844] ss:$8 sps:$4 sm:$0xff]   ;;  %v453_v17 = vadd.s32 %v5831_v15, %v427_v11  ;;  %v465_v24 = vadd.s32 %v5831_v15, %v439_v16 }
 0x12b   : > { %3241 = vmatpush1.bf16.msra.mxu1 %v4887_v20  ;;  %v4932_v20 = vld [vmem:[#allocation7 + $0x840] ss:$8 sps:$4 sm:$0xff]   ;;  %v4017_v32 = vshrl.u32 %v465_v24, 16 }
 0x12c   : > { %3487 = vmatpush1.bf16.msra.mxu0 %v4890_v21  ;;  %3242 = vmatprep.subr.bf16.mxu1 %v4895_v22  ;;  %v4937_v21 = vld [vmem:[#allocation7 + $0x254] ss:$8 sps:$4 sm:$0xff]   ;;  %v416_v22 = vadd.s32 2432, %v5822_v4 }
 0x12d   : > { %3488 = vmatprep.subr.bf16.mxu0 %v4898_v25  ;;  %v4005_v25 = vshrl.u32 %v453_v17, 16  ;;  %v537_v40 = vxor.u32 %v4017_v32, %v465_v24  ;;  %v4986_v32 = vld [vmem:[#allocation7 + $0x8d0] ss:$8 sps:$4 sm:$0xff]  }
 0x12e   : > { %v442_v30 = vadd.s32 %v5827_v8, %v416_v22  ;;  %v4977_v22 = vld [vmem:[#allocation7 + $0x2c0] ss:$8 sps:$4 sm:$0xff]  }
 0x12f   : > { %3243 = vmatpush1.bf16.msra.mxu1 %v4893_v27  ;;  %v4935_v27 = vld [vmem:[#allocation7 + $0x250] ss:$8 sps:$4 sm:$0xff]   ;;  %v525_v33 = vxor.u32 %v4005_v25, %v453_v17  ;;  %v561_v48 = vmul.u32 2246822507, %v537_v40  ;;  %v4979_v17 = vld [vmem:[#allocation7 + $0x2c4] ss:$8 sps:$4 sm:$0xff]  }
 0x130   : > { %3489 = vmatpush1.bf16.msra.mxu0 %v4896_v28  ;;  %3244 = vmatprep.subr.bf16.mxu1 %v4901_v29  ;;  %v4938_v28 = vld [vmem:[#allocation7 + $0x850] ss:$8 sps:$4 sm:$0xff]   ;;  %v4943_v29 = vld [vmem:[#allocation7 + $0x264] ss:$8 sps:$4 sm:$0xff]   ;;  %v468_v38 = vadd.s32 %v5831_v15, %v442_v30  ;;  %v4985_v25 = vld [vmem:[#allocation7 + $0x2d4] ss:$8 sps:$4 sm:$0xff]  }
 0x131   : > { %3490 = vmatprep.subr.bf16.mxu0 %v4904_v34  ;;  %v456_v34 = vadd.s32 %v5831_v15, %v430_v26  ;;  %v4983_v30 = vld [vmem:[#allocation7 + $0x2d0] ss:$8 sps:$4 sm:$0xff]   ;;  %v371_v40 = vld [vmem:[%s5801_s18 + $0x20] sm:$0xff] }
 0x133   : > { %3245 = vmatpush1.bf16.msra.mxu1 %v4899_v36  ;;  %v4944_v36 = vld [vmem:[#allocation7 + $0x860] ss:$8 sps:$4 sm:$0xff]   ;;  %v4008_v42 = vshrl.u32 %v456_v34, 16 }
 0x134   : > { %3491 = vmatpush1.bf16.msra.mxu0 %v4902_v37  ;;  %3255 = vmatprep.subr.bf16.mxu1 %v4907_v41  ;;  %v4949_v37 = vld [vmem:[#allocation7 + $0x274] ss:$8 sps:$4 sm:$0xff]   ;;  %v549_v41 = vmul.u32 2246822507, %v525_v33  ;;  %v4991_v33 = vld [vmem:[#allocation7 + $0x2e4] ss:$8 sps:$4 sm:$0xff]  }
 0x135   : > { %3501 = vmatprep.subr.bf16.mxu0 %v4910_v43  ;;  %v4947_v43 = vld [vmem:[#allocation7 + $0x270] ss:$8 sps:$4 sm:$0xff]   ;;  %v528_v50 = vxor.u32 %v4008_v42, %v456_v34  ;;  %v5037_v42 = vld [vmem:[#allocation7 + $0x360] ss:$8 sps:$4 sm:$0xff]  }
 0x136   : > { %4468 = vmatmul.mubr.msk.bf16.vlgmr.msra.gmra.mrb[0].mxu1 %vm4466_vm14, %v4467_v46  ;;  %v4020_v46 = vshrl.u32 %v468_v38, 16 }
 0x137   : > { %4504 = vmatmul.mubr.msk.bf16.vlgmr.msra.gmra.mrb[0].mxu0 %vm4502_vm15, %v4503_v47  ;;  %3256 = vmatpush1.bf16.msra.mxu1 %v4905_v44  ;;  %v4950_v44 = vld [vmem:[#allocation7 + $0x870] ss:$8 sps:$4 sm:$0xff]   ;;  %v4958_v47 = vld [vmem:[#allocation7 + $0x884] ss:$8 sps:$4 sm:$0xff]   ;;  %v552_v58 = vmul.u32 2246822507, %v528_v50 }
 0x138   : > { %3502 = vmatpush1.bf16.msra.mxu0 %v4908_v45  ;;  %3257 = vmatprep.subr.bf16.mxu1 %v4913_v49  ;;  %v4955_v45 = vld [vmem:[#allocation7 + $0x284] ss:$8 sps:$4 sm:$0xff]   ;;  %v4029_v49 = vshrl.u32 %v549_v41, 13 }
 0x139   : > { %3503 = vmatprep.subr.bf16.mxu0 %v4916_v51  ;;  %4471 = vmatprep.mubr.msk.bf16.mxu1 %vm4469_vm1, %v4470_v0  ;;  %v4953_v51 = vld [vmem:[#allocation7 + $0x280] ss:$8 sps:$4 sm:$0xff]   ;;  %v4032_v2 = vshrl.u32 %v552_v58, 13 }
 0x13a   : > { %4507 = vmatprep.mubr.msk.bf16.mxu0 %vm4505_vm3, %v4506_v10  ;;  %v4976_v10 = vld [vmem:[#allocation7 + $0x8b4] ss:$8 sps:$4 sm:$0xff]  }
 0x13b   : > { %3258 = vmatpush1.bf16.msra.mxu1 %v4911_v52  ;;  %v4956_v52 = vld [vmem:[#allocation7 + $0x880] ss:$8 sps:$4 sm:$0xff]  }
 0x13c   : > { %3504 = vmatpush1.bf16.msra.mxu0 %v4914_v54  ;;  %3259 = vmatprep.subr.bf16.mxu1 %v4919_v56  ;;  %v540_v54 = vxor.u32 %v4020_v46, %v468_v38  ;;  %v4041_v56 = vshrl.u32 %v561_v48, 13 }
 0x13d   : > { %3505 = vmatprep.subr.bf16.mxu0 %v4922_v57  ;;  %v621_v57 = vxor.u32 %v4029_v49, %v549_v41  ;;  %v4997_v41 = vld [vmem:[#allocation7 + $0x2f4] ss:$8 sps:$4 sm:$0xff]   ;;  %v789_v49 = vmul.f32 3.3333333, %v371_v40 }
 0x13e   : > { %v633_v0 = vxor.u32 %v4041_v56, %v561_v48  ;;  %v4998_v48 = vld [vmem:[#allocation7 + $0x8f0] ss:$8 sps:$4 sm:$0xff]   ;;  %v5006_v56 = vld [vmem:[#allocation7 + $0x904] ss:$8 sps:$4 sm:$0xff]  }
 0x13f   : > { %3260 = vmatpush1.bf16.msra.mxu1 %v4917_v60  ;;  %v4962_v60 = vld [vmem:[#allocation7 + $0x890] ss:$8 sps:$4 sm:$0xff]   ;;  %v645_v1 = vmul.u32 3266489909, %v621_v57  ;;  %v5001_v57 = vld [vmem:[#allocation7 + $0x300] ss:$8 sps:$4 sm:$0xff]  }
 0x140   : > { %3506 = vmatpush1.bf16.msra.mxu0 %v4920_v62  ;;  %3261 = vmatprep.subr.bf16.mxu1 %v4925_v5  ;;  %v564_v62 = vmul.u32 2246822507, %v540_v54  ;;  %v4965_v5 = vld [vmem:[#allocation7 + $0x2a0] ss:$8 sps:$4 sm:$0xff]   ;;  %v657_v11 = vmul.u32 3266489909, %v633_v0 }
 0x141   : > { %3507 = vmatprep.subr.bf16.mxu0 %v4928_v6  ;;  %v4968_v6 = vld [vmem:[#allocation7 + $0x8a0] ss:$8 sps:$4 sm:$0xff]   ;;  %v4053_v16 = vshrl.u32 %v645_v1, 16  ;;  %v5003_v54 = vld [vmem:[#allocation7 + $0x304] ss:$8 sps:$4 sm:$0xff]  }
 0x142   : > { %v5009_v0 = vld [vmem:[#allocation7 + $0x314] ss:$8 sps:$4 sm:$0xff]  }
 0x143   : > { %3262 = vmatpush1.bf16.msra.mxu1 %v4923_v9  ;;  %v4044_v9 = vshrl.u32 %v564_v62, 13  ;;  %v717_v24 = vxor.u32 %v4053_v16, %v645_v1  ;;  %v5021_v16 = vld [vmem:[#allocation7 + $0x334] ss:$8 sps:$4 sm:$0xff]  }
 0x144   : > { %3508 = vmatpush1.bf16.msra.mxu0 %v4926_v12  ;;  %3263 = vmatprep.subr.bf16.mxu1 %v4931_v13  ;;  %v624_v12 = vxor.u32 %v4032_v2, %v552_v58  ;;  %v4971_v13 = vld [vmem:[#allocation7 + $0x2b0] ss:$8 sps:$4 sm:$0xff]   ;;  %v5012_v2 = vld [vmem:[#allocation7 + $0x914] ss:$8 sps:$4 sm:$0xff]  }
 0x145   : > { %3509 = vmatprep.subr.bf16.mxu0 %v4934_v14  ;;  %v4974_v14 = vld [vmem:[#allocation7 + $0x8b0] ss:$8 sps:$4 sm:$0xff]   ;;  %v636_v18 = vxor.u32 %v4044_v9, %v564_v62 }
 0x146   : > { %v5010_v9 = vld [vmem:[#allocation7 + $0x910] ss:$8 sps:$4 sm:$0xff]  }
 0x147   : > { %3264 = vmatpush1.bf16.msra.mxu1 %v4929_v19  ;;  %v4982_v19 = vld [vmem:[#allocation7 + $0x8c4] ss:$8 sps:$4 sm:$0xff]   ;;  %v660_v26 = vmul.u32 3266489909, %v636_v18  ;;  %v415_v18 = vadd.s32 2304, %v5822_v4 }
 0x148   : > { %3510 = vmatpush1.bf16.msra.mxu0 %v4932_v20  ;;  %3265 = vmatprep.subr.bf16.mxu1 %v4937_v21  ;;  %v4065_v20 = vshrl.u32 %v657_v11, 16  ;;  %v648_v21 = vmul.u32 3266489909, %v624_v12  ;;  %v403_v12 = vadd.s32 768, %v5822_v4 }
 0x149   : > { %3511 = vmatprep.subr.bf16.mxu0 %v4940_v23  ;;  %v4980_v23 = vld [vmem:[#allocation7 + $0x8c0] ss:$8 sps:$4 sm:$0xff]   ;;  %v4068_v34 = vshrl.u32 %v660_v26, 16 }
 0x14b   : > { %3266 = vmatpush1.bf16.msra.mxu1 %v4935_v27  ;;  %v4988_v27 = vld [vmem:[#allocation7 + $0x8d4] ss:$8 sps:$4 sm:$0xff]  }
 0x14c   : > { %3512 = vmatpush1.bf16.msra.mxu0 %v4938_v28  ;;  %3267 = vmatprep.subr.bf16.mxu1 %v4943_v29  ;;  %v729_v28 = vxor.u32 %v4065_v20, %v657_v11  ;;  %v4056_v29 = vshrl.u32 %v648_v21, 16  ;;  %v5018_v11 = vld [vmem:[#allocation7 + $0x924] ss:$8 sps:$4 sm:$0xff]   ;;  %v5019_v20 = vld [vmem:[#allocation7 + $0x330] ss:$8 sps:$4 sm:$0xff]  }
 0x14d   : > { %3513 = vmatprep.subr.bf16.mxu0 %v4946_v31  ;;  %v741_v31 = vand.u32 16777215, %v717_v24  ;;  %v441_v24 = vadd.s32 %v5827_v8, %v415_v18 }
 0x14e   : > { %v720_v38 = vxor.u32 %v4056_v29, %v648_v21  ;;  %v5022_v21 = vld [vmem:[#allocation7 + $0x930] ss:$8 sps:$4 sm:$0xff]   ;;  %v5033_v29 = vld [vmem:[#allocation7 + $0x354] ss:$8 sps:$4 sm:$0xff]  }
 0x14f   : > { %3268 = vmatpush1.bf16.msra.mxu1 %v4941_v35  ;;  %v4994_v35 = vld [vmem:[#allocation7 + $0x8e4] ss:$8 sps:$4 sm:$0xff]   ;;  %vm5957_vm4 = vcmp.lt.s32.totalorder %v741_v31, 5033164  ;;  %v5036_v31 = vld [vmem:[#allocation7 + $0x954] ss:$8 sps:$4 sm:$0xff]  }
 0x150   : > { %3514 = vmatpush1.bf16.msra.mxu0 %v4944_v36  ;;  %3269 = vmatprep.subr.bf16.mxu1 %v4949_v37  ;;  %v753_v36 = vand.u32 16777215, %v729_v28  ;;  %v4989_v37 = vld [vmem:[#allocation7 + $0x2e0] ss:$8 sps:$4 sm:$0xff]   ;;  %v744_v50 = vand.u32 16777215, %v720_v38  ;;  %vm4472_vm6 = vmpackc.low %vm5957_vm4, %vm5957_vm4 }
 0x151   : > { %3515 = vmatprep.subr.bf16.mxu0 %v4952_v39  ;;  %v4992_v39 = vld [vmem:[#allocation7 + $0x8e0] ss:$8 sps:$4 sm:$0xff]   ;;  %v406_v28 = vadd.s32 1152, %v5822_v4 }
 0x152   : > { %vm5962_vm5 = vcmp.lt.s32.totalorder %v753_v36, 5033164  ;;  %vm5974_vm8 = vcmp.lt.s32.totalorder %v744_v50, 5033164  ;;  %v5043_v50 = vld [vmem:[#allocation7 + $0x370] ss:$8 sps:$4 sm:$0xff]  }
 0x153   : > { %3270 = vmatpush1.bf16.msra.mxu1 %v4947_v43  ;;  %v383_v43 = vld [vmem:[%s5801_s18 + $0x80] sm:$0xff]  ;;  %vm4508_vm7 = vmpackc.low %vm5962_vm5, %vm5962_vm5  ;;  %v432_v36 = vadd.s32 %v5827_v8, %v406_v28 }
 0x154   : > { %3516 = vmatpush1.bf16.msra.mxu0 %v4950_v44  ;;  %3271 = vmatprep.subr.bf16.mxu1 %v4955_v45  ;;  %v732_v44 = vxor.u32 %v4068_v34, %v660_v26  ;;  %v5000_v45 = vld [vmem:[#allocation7 + $0x8f4] ss:$8 sps:$4 sm:$0xff]   ;;  %vm4475_vm10 = vmpackc.low %vm5974_vm8, %vm5974_vm8  ;;  %v5025_v26 = vld [vmem:[#allocation7 + $0x340] ss:$8 sps:$4 sm:$0xff]  }
 0x155   : > { %3517 = vmatprep.subr.bf16.mxu0 %v4958_v47  ;;  %v4995_v47 = vld [vmem:[#allocation7 + $0x2f0] ss:$8 sps:$4 sm:$0xff]  }
 0x156   : > { %v5031_v34 = vld [vmem:[#allocation7 + $0x350] ss:$8 sps:$4 sm:$0xff]  }
 0x157   : > { %3272 = vmatpush1.bf16.msra.mxu1 %v4953_v51  ;;  %v801_v51 = vmul.f32 3.3333333, %v383_v43  ;;  %v5040_v43 = vld [vmem:[#allocation7 + $0x960] ss:$8 sps:$4 sm:$0xff]  }
 0x158   : > { %3518 = vmatpush1.bf16.msra.mxu0 %v4956_v52  ;;  %3273 = vmatprep.subr.bf16.mxu1 %v4961_v53  ;;  %v374_v52 = vld [vmem:[%s5801_s18 + $0x38] sm:$0xff] }
 0x159   : > { %3519 = vmatprep.subr.bf16.mxu0 %v4964_v55  ;;  %v386_v53 = vld [vmem:[%s5801_s18 + $0x98] sm:$0xff]  ;;  %v756_v55 = vand.u32 16777215, %v732_v44  ;;  %v792_v58 = vmul.f32 3.3333333, %v374_v52  ;;  %v4509_v62 = vpack.c.bf16 %v801_v51, %v801_v51  ;;  %v458_v44 = vadd.s32 %v5831_v15, %v432_v36 }
 0x15a   : > { %v5046_v51 = vld [vmem:[#allocation7 + $0x970] ss:$8 sps:$4 sm:$0xff]  }
 0x15b   : > { %3274 = vmatpush1.bf16.msra.mxu1 %v4959_v59  ;;  %v804_v59 = vmul.f32 3.3333333, %v386_v53  ;;  %vm5978_vm9 = vcmp.lt.s32.totalorder %v756_v55, 5033164  ;;  %v4010_v52 = vshrl.u32 %v458_v44, 16 }
 0x15c   : > { %3520 = vmatpush1.bf16.msra.mxu0 %v4962_v60  ;;  %3275 = vmatprep.subr.bf16.mxu1 %v4967_v61  ;;  %v5004_v60 = vld [vmem:[#allocation7 + $0x900] ss:$8 sps:$4 sm:$0xff]   ;;  %v4473_v61 = vpack.c.bf16 %v789_v49, %v789_v49  ;;  %vm4511_vm11 = vmpackc.low %vm5978_vm9, %vm5978_vm9  ;;  %v5051_v53 = vld [vmem:[#allocation7 + $0x384] ss:$8 sps:$4 sm:$0xff]  }
 0x15d   : > { %3521 = vmatprep.subr.bf16.mxu0 %v4970_v63  ;;  %v5054_v55 = vld [vmem:[#allocation7 + $0x984] ss:$8 sps:$4 sm:$0xff]   ;;  %v5060_v63 = vld [vmem:[#allocation7 + $0x994] ss:$8 sps:$4 sm:$0xff]  }
 0x15f   : > { %3276 = vmatpush1.bf16.msra.mxu1 %v4965_v5  ;;  %v5007_v5 = vld [vmem:[#allocation7 + $0x310] ss:$8 sps:$4 sm:$0xff]  }
 0x160   : > { %3522 = vmatpush1.bf16.msra.mxu0 %v4968_v6  ;;  %3277 = vmatprep.subr.bf16.mxu1 %v4973_v7  ;;  %v4476_v6 = vpack.c.bf16 %v792_v58, %v792_v58  ;;  %v4512_v7 = vpack.c.bf16 %v804_v59, %v804_v59  ;;  %v530_v58 = vxor.u32 %v4010_v52, %v458_v44  ;;  %v5049_v59 = vld [vmem:[#allocation7 + $0x380] ss:$8 sps:$4 sm:$0xff]  }
 0x161   : > { %3523 = vmatprep.subr.bf16.mxu0 %v4976_v10  ;;  %v5015_v10 = vld [vmem:[#allocation7 + $0x324] ss:$8 sps:$4 sm:$0xff]  }
 0x163   : > { %3278 = vmatpush1.bf16.msra.mxu1 %v4971_v13  ;;  %v5013_v13 = vld [vmem:[#allocation7 + $0x320] ss:$8 sps:$4 sm:$0xff]  }
 0x164   : > { %3524 = vmatpush1.bf16.msra.mxu0 %v4974_v14  ;;  %3279 = vmatprep.subr.bf16.mxu1 %v4979_v17  ;;  %v5016_v14 = vld [vmem:[#allocation7 + $0x920] ss:$8 sps:$4 sm:$0xff]   ;;  %v5024_v17 = vld [vmem:[#allocation7 + $0x934] ss:$8 sps:$4 sm:$0xff]  }
 0x165   : > { %3525 = vmatprep.subr.bf16.mxu0 %v4982_v19  ;;  %v429_v19 = vadd.s32 %v5827_v8, %v403_v12 }
 0x167   : > { %3280 = vmatpush1.bf16.msra.mxu1 %v4977_v22  ;;  %v5027_v22 = vld [vmem:[#allocation7 + $0x344] ss:$8 sps:$4 sm:$0xff]  }
 0x168   : > { %3526 = vmatpush1.bf16.msra.mxu0 %v4980_v23  ;;  %3281 = vmatprep.subr.bf16.mxu1 %v4985_v25  ;;  %v5030_v23 = vld [vmem:[#allocation7 + $0x944] ss:$8 sps:$4 sm:$0xff]   ;;  %v455_v25 = vadd.s32 %v5831_v15, %v429_v19  ;;  %v5072_v19 = vld [vmem:[#allocation7 + $0x9b4] ss:$8 sps:$4 sm:$0xff]  }
 0x169   : > { %3527 = vmatprep.subr.bf16.mxu0 %v4988_v27  ;;  %v5028_v27 = vld [vmem:[#allocation7 + $0x940] ss:$8 sps:$4 sm:$0xff]  }
 0x16b   : > { %3282 = vmatpush1.bf16.msra.mxu1 %v4983_v30  ;;  %v418_v30 = vadd.s32 2688, %v5822_v4 }
 0x16c   : > { %3528 = vmatpush1.bf16.msra.mxu0 %v4986_v32  ;;  %3283 = vmatprep.subr.bf16.mxu1 %v4991_v33  ;;  %v467_v32 = vadd.s32 %v5831_v15, %v441_v24  ;;  %v4007_v33 = vshrl.u32 %v455_v25, 16 }
 0x16d   : > { %3529 = vmatprep.subr.bf16.mxu0 %v4994_v35  ;;  %v5034_v35 = vld [vmem:[#allocation7 + $0x950] ss:$8 sps:$4 sm:$0xff]   ;;  %v444_v38 = vadd.s32 %v5827_v8, %v418_v30 }
 0x16e   : > { %v4019_v40 = vshrl.u32 %v467_v32, 16 }
 0x16f   : > { %3284 = vmatpush1.bf16.msra.mxu1 %v4989_v37  ;;  %v5039_v37 = vld [vmem:[#allocation7 + $0x364] ss:$8 sps:$4 sm:$0xff]   ;;  %v470_v46 = vadd.s32 %v5831_v15, %v444_v38  ;;  %v5079_v38 = vld [vmem:[#allocation7 + $0x3d0] ss:$8 sps:$4 sm:$0xff]  }
 0x170   : > { %3530 = vmatpush1.bf16.msra.mxu0 %v4992_v39  ;;  %3285 = vmatprep.subr.bf16.mxu1 %v4997_v41  ;;  %v5042_v39 = vld [vmem:[#allocation7 + $0x964] ss:$8 sps:$4 sm:$0xff]   ;;  %v527_v41 = vxor.u32 %v4007_v33, %v455_v25  ;;  %v5081_v33 = vld [vmem:[#allocation7 + $0x3d4] ss:$8 sps:$4 sm:$0xff]  }
 0x171   : > { %3531 = vmatprep.subr.bf16.mxu0 %v5000_v45  ;;  %v5045_v45 = vld [vmem:[#allocation7 + $0x374] ss:$8 sps:$4 sm:$0xff]   ;;  %v5075_v25 = vld [vmem:[#allocation7 + $0x3c4] ss:$8 sps:$4 sm:$0xff]  }
 0x172   : > { %v551_v49 = vmul.u32 2246822507, %v527_v41  ;;  %v5087_v41 = vld [vmem:[#allocation7 + $0x3e4] ss:$8 sps:$4 sm:$0xff]  }
 0x173   : > { %3286 = vmatpush1.bf16.msra.mxu1 %v4995_v47  ;;  %v5048_v47 = vld [vmem:[#allocation7 + $0x974] ss:$8 sps:$4 sm:$0xff]  }
 0x174   : > { %3532 = vmatpush1.bf16.msra.mxu0 %v4998_v48  ;;  %3296 = vmatprep.subr.bf16.mxu1 %v5003_v54  ;;  %v539_v48 = vxor.u32 %v4019_v40, %v467_v32  ;;  %v4022_v54 = vshrl.u32 %v470_v46, 16 }
 0x175   : > { %3542 = vmatprep.subr.bf16.mxu0 %v5006_v56 }
 0x176   : > { %4474 = vmatmul.mubr.msk.bf16.vlgmr.msra.gmra.mrb[0].mxu1 %vm4472_vm6, %v4473_v61  ;;  %v563_v56 = vmul.u32 2246822507, %v539_v48  ;;  %v542_v61 = vxor.u32 %v4022_v54, %v470_v46  ;;  %v5088_v46 = vld [vmem:[#allocation7 + $0x9e0] ss:$8 sps:$4 sm:$0xff]   ;;  %v385_v48 = vld [vmem:[%s5801_s18 + $0x90] sm:$0xff] }
 0x177   : > { %4510 = vmatmul.mubr.msk.bf16.vlgmr.msra.gmra.mrb[0].mxu0 %vm4508_vm7, %v4509_v62  ;;  %3297 = vmatpush1.bf16.msra.mxu1 %v5001_v57  ;;  %v4031_v57 = vshrl.u32 %v551_v49, 13  ;;  %v5057_v62 = vld [vmem:[#allocation7 + $0x394] ss:$8 sps:$4 sm:$0xff]  }
 0x178   : > { %3543 = vmatpush1.bf16.msra.mxu0 %v5004_v60  ;;  %3298 = vmatprep.subr.bf16.mxu1 %v5009_v0  ;;  %v5052_v60 = vld [vmem:[#allocation7 + $0x980] ss:$8 sps:$4 sm:$0xff]   ;;  %v4043_v0 = vshrl.u32 %v563_v56, 13 }
 0x179   : > { %3544 = vmatprep.subr.bf16.mxu0 %v5012_v2  ;;  %4477 = vmatprep.mubr.msk.bf16.mxu1 %vm4475_vm10, %v4476_v6  ;;  %v623_v1 = vxor.u32 %v4031_v57, %v551_v49  ;;  %v5055_v2 = vld [vmem:[#allocation7 + $0x390] ss:$8 sps:$4 sm:$0xff]  }
 0x17a   : > { %4513 = vmatprep.mubr.msk.bf16.mxu0 %vm4511_vm11, %v4512_v7  ;;  %v5058_v6 = vld [vmem:[#allocation7 + $0x990] ss:$8 sps:$4 sm:$0xff]   ;;  %v5063_v7 = vld [vmem:[#allocation7 + $0x3a4] ss:$8 sps:$4 sm:$0xff]  }
 0x17b   : > { %3299 = vmatpush1.bf16.msra.mxu1 %v5007_v5  ;;  %v554_v5 = vmul.u32 2246822507, %v530_v58  ;;  %v647_v12 = vmul.u32 3266489909, %v623_v1  ;;  %v803_v58 = vmul.f32 3.3333333, %v385_v48 }
 0x17c   : > { %3545 = vmatpush1.bf16.msra.mxu0 %v5010_v9  ;;  %3300 = vmatprep.subr.bf16.mxu1 %v5015_v10  ;;  %v566_v9 = vmul.u32 2246822507, %v542_v61  ;;  %v5066_v10 = vld [vmem:[#allocation7 + $0x9a4] ss:$8 sps:$4 sm:$0xff]  }
 0x17d   : > { %3546 = vmatprep.subr.bf16.mxu0 %v5018_v11  ;;  %v635_v11 = vxor.u32 %v4043_v0, %v563_v56  ;;  %v5094_v56 = vld [vmem:[#allocation7 + $0x9f0] ss:$8 sps:$4 sm:$0xff]   ;;  %v388_v61 = vld [vmem:[%s5801_s18 + $0xa8] sm:$0xff] }
 0x17e   : > { %v4046_v18 = vshrl.u32 %v566_v9, 13  ;;  %v5102_v1 = vld [vmem:[#allocation7 + $0xa04] ss:$8 sps:$4 sm:$0xff]  }
 0x17f   : > { %3301 = vmatpush1.bf16.msra.mxu1 %v5013_v13  ;;  %v5061_v13 = vld [vmem:[#allocation7 + $0x3a0] ss:$8 sps:$4 sm:$0xff]  }
 0x180   : > { %3547 = vmatpush1.bf16.msra.mxu0 %v5016_v14  ;;  %3302 = vmatprep.subr.bf16.mxu1 %v5021_v16  ;;  %v5064_v14 = vld [vmem:[#allocation7 + $0x9a0] ss:$8 sps:$4 sm:$0xff]   ;;  %v4034_v16 = vshrl.u32 %v554_v5, 13 }
 0x181   : > { %3548 = vmatprep.subr.bf16.mxu0 %v5024_v17  ;;  %v5069_v17 = vld [vmem:[#allocation7 + $0x3b4] ss:$8 sps:$4 sm:$0xff]  }
 0x182   : > { %v626_v24 = vxor.u32 %v4034_v16, %v554_v5  ;;  %v5108_v16 = vld [vmem:[#allocation7 + $0xa14] ss:$8 sps:$4 sm:$0xff]  }
 0x183   : > { %3303 = vmatpush1.bf16.msra.mxu1 %v5019_v20  ;;  %v659_v20 = vmul.u32 3266489909, %v635_v11 }
 0x184   : > { %3549 = vmatpush1.bf16.msra.mxu0 %v5022_v21  ;;  %3304 = vmatprep.subr.bf16.mxu1 %v5027_v22  ;;  %v4055_v21 = vshrl.u32 %v647_v12, 16  ;;  %v5067_v22 = vld [vmem:[#allocation7 + $0x3b0] ss:$8 sps:$4 sm:$0xff]   ;;  %v650_v32 = vmul.u32 3266489909, %v626_v24 }
 0x185   : > { %3550 = vmatprep.subr.bf16.mxu0 %v5030_v23  ;;  %v5070_v23 = vld [vmem:[#allocation7 + $0x9b0] ss:$8 sps:$4 sm:$0xff]   ;;  %v4067_v28 = vshrl.u32 %v659_v20, 16  ;;  %v5114_v24 = vld [vmem:[#allocation7 + $0xa24] ss:$8 sps:$4 sm:$0xff]  }
 0x186   : > { %v719_v30 = vxor.u32 %v4055_v21, %v647_v12  ;;  %v4058_v40 = vshrl.u32 %v650_v32, 16  ;;  %v5106_v21 = vld [vmem:[#allocation7 + $0xa10] ss:$8 sps:$4 sm:$0xff]  }
 0x187   : > { %3305 = vmatpush1.bf16.msra.mxu1 %v5025_v26  ;;  %v638_v26 = vxor.u32 %v4046_v18, %v566_v9  ;;  %v731_v36 = vxor.u32 %v4067_v28, %v659_v20  ;;  %v417_v20 = vadd.s32 2560, %v5822_v4 }
 0x188   : > { %3551 = vmatpush1.bf16.msra.mxu0 %v5028_v27  ;;  %3306 = vmatprep.subr.bf16.mxu1 %v5033_v29  ;;  %v5078_v27 = vld [vmem:[#allocation7 + $0x9c4] ss:$8 sps:$4 sm:$0xff]   ;;  %v5073_v29 = vld [vmem:[#allocation7 + $0x3c0] ss:$8 sps:$4 sm:$0xff]   ;;  %v722_v49 = vxor.u32 %v4058_v40, %v650_v32  ;;  %v5115_v32 = vld [vmem:[#allocation7 + $0x430] ss:$8 sps:$4 sm:$0xff]  }
 0x189   : > { %3552 = vmatprep.subr.bf16.mxu0 %v5036_v31  ;;  %v5076_v31 = vld [vmem:[#allocation7 + $0x9c0] ss:$8 sps:$4 sm:$0xff]   ;;  %v755_v44 = vand.u32 16777215, %v731_v36  ;;  %v5126_v36 = vld [vmem:[#allocation7 + $0xa44] ss:$8 sps:$4 sm:$0xff]  }
 0x18a   : > { %v408_v40 = vadd.s32 1408, %v5822_v4 }
 0x18b   : > { %3307 = vmatpush1.bf16.msra.mxu1 %v5031_v34  ;;  %v662_v34 = vmul.u32 3266489909, %v638_v26  ;;  %vm6011_vm13 = vcmp.lt.s32.totalorder %v755_v44, 5033164  ;;  %v5109_v26 = vld [vmem:[#allocation7 + $0x420] ss:$8 sps:$4 sm:$0xff]  }
 0x18c   : > { %3553 = vmatpush1.bf16.msra.mxu0 %v5034_v35  ;;  %3308 = vmatprep.subr.bf16.mxu1 %v5039_v37  ;;  %v5084_v35 = vld [vmem:[#allocation7 + $0x9d4] ss:$8 sps:$4 sm:$0xff]   ;;  %v743_v37 = vand.u32 16777215, %v719_v30  ;;  %vm4514_vm15 = vmpackc.low %vm6011_vm13, %vm6011_vm13 }
 0x18d   : > { %3554 = vmatprep.subr.bf16.mxu0 %v5042_v39  ;;  %v5082_v39 = vld [vmem:[#allocation7 + $0x9d0] ss:$8 sps:$4 sm:$0xff]   ;;  %v5120_v30 = vld [vmem:[#allocation7 + $0xa34] ss:$8 sps:$4 sm:$0xff]  }
 0x18e   : > { %vm6007_vm12 = vcmp.lt.s32.totalorder %v743_v37, 5033164  ;;  %v5132_v44 = vld [vmem:[#allocation7 + $0xa54] ss:$8 sps:$4 sm:$0xff]  }
 0x18f   : > { %3309 = vmatpush1.bf16.msra.mxu1 %v5037_v42  ;;  %v4070_v42 = vshrl.u32 %v662_v34, 16  ;;  %vm4478_vm14 = vmpackc.low %vm6007_vm12, %vm6007_vm12 }
 0x190   : > { %3555 = vmatpush1.bf16.msra.mxu0 %v5040_v43  ;;  %3310 = vmatprep.subr.bf16.mxu1 %v5045_v45  ;;  %v5090_v43 = vld [vmem:[#allocation7 + $0x9e4] ss:$8 sps:$4 sm:$0xff]   ;;  %v5085_v45 = vld [vmem:[#allocation7 + $0x3e0] ss:$8 sps:$4 sm:$0xff]  }
 0x191   : > { %3556 = vmatprep.subr.bf16.mxu0 %v5048_v47  ;;  %v373_v47 = vld [vmem:[%s5801_s18 + $0x30] sm:$0xff]  ;;  %v734_v52 = vxor.u32 %v4070_v42, %v662_v34  ;;  %v5124_v42 = vld [vmem:[#allocation7 + $0xa40] ss:$8 sps:$4 sm:$0xff]  }
 0x192   : > { %v791_v57 = vmul.f32 3.3333333, %v373_v47  ;;  %v5118_v34 = vld [vmem:[#allocation7 + $0xa30] ss:$8 sps:$4 sm:$0xff]   ;;  %v434_v47 = vadd.s32 %v5827_v8, %v408_v40  ;;  %v5177_v40 = vld [vmem:[#allocation7 + $0x4d4] ss:$8 sps:$4 sm:$0xff]  }
 0x193   : > { %3311 = vmatpush1.bf16.msra.mxu1 %v5043_v50  ;;  %v5093_v50 = vld [vmem:[#allocation7 + $0x3f4] ss:$8 sps:$4 sm:$0xff]   ;;  %v758_v0 = vand.u32 16777215, %v734_v52  ;;  %v5136_v52 = vld [vmem:[#allocation7 + $0xa60] ss:$8 sps:$4 sm:$0xff]  }
 0x194   : > { %3557 = vmatpush1.bf16.msra.mxu0 %v5046_v51  ;;  %3312 = vmatprep.subr.bf16.mxu1 %v5051_v53  ;;  %v5096_v53 = vld [vmem:[#allocation7 + $0x9f4] ss:$8 sps:$4 sm:$0xff]   ;;  %v4479_v9 = vpack.c.bf16 %v791_v57, %v791_v57  ;;  %v5133_v51 = vld [vmem:[#allocation7 + $0x460] ss:$8 sps:$4 sm:$0xff]   ;;  %v5139_v57 = vld [vmem:[#allocation7 + $0x470] ss:$8 sps:$4 sm:$0xff]  }
 0x195   : > { %3558 = vmatprep.subr.bf16.mxu0 %v5054_v55  ;;  %v5091_v55 = vld [vmem:[#allocation7 + $0x3f0] ss:$8 sps:$4 sm:$0xff]   ;;  %vm6029_vm1 = vcmp.lt.s32.totalorder %v758_v0, 5033164 }
 0x196   : > { %vm4517_vm3 = vmpackc.low %vm6029_vm1, %vm6029_vm1 }
 0x197   : > { %3313 = vmatpush1.bf16.msra.mxu1 %v5049_v59  ;;  %v376_v59 = vld [vmem:[%s5801_s18 + $0x48] sm:$0xff] }
 0x198   : > { %3559 = vmatpush1.bf16.msra.mxu0 %v5052_v60  ;;  %3314 = vmatprep.subr.bf16.mxu1 %v5057_v62  ;;  %v746_v60 = vand.u32 16777215, %v722_v49  ;;  %v405_v62 = vadd.s32 1024, %v5822_v4  ;;  %v794_v5 = vmul.f32 3.3333333, %v376_v59 }
 0x199   : > { %3560 = vmatprep.subr.bf16.mxu0 %v5060_v63  ;;  %v5099_v63 = vld [vmem:[#allocation7 + $0x404] ss:$8 sps:$4 sm:$0xff]  }
 0x19a   : > { %vm6024_vm0 = vcmp.lt.s32.totalorder %v746_v60, 5033164  ;;  %v431_v12 = vadd.s32 %v5827_v8, %v405_v62  ;;  %v4482_v18 = vpack.c.bf16 %v794_v5, %v794_v5  ;;  %v5135_v49 = vld [vmem:[#allocation7 + $0x464] ss:$8 sps:$4 sm:$0xff]  }
 0x19b   : > { %3315 = vmatpush1.bf16.msra.mxu1 %v5055_v2  ;;  %v5097_v2 = vld [vmem:[#allocation7 + $0x400] ss:$8 sps:$4 sm:$0xff]   ;;  %vm4481_vm2 = vmpackc.low %vm6024_vm0, %vm6024_vm0  ;;  %v5147_v59 = vld [vmem:[#allocation7 + $0x484] ss:$8 sps:$4 sm:$0xff]   ;;  %vm3869_vm0 = vcmask 7168  }
 0x19c   : > { %3561 = vmatpush1.bf16.msra.mxu0 %v5058_v6  ;;  %3316 = vmatprep.subr.bf16.mxu1 %v5063_v7  ;;  %v806_v6 = vmul.f32 3.3333333, %v388_v61  ;;  %v5100_v7 = vld [vmem:[#allocation7 + $0xa00] ss:$8 sps:$4 sm:$0xff]   ;;  %v5150_v60 = vld [vmem:[#allocation7 + $0xa84] ss:$8 sps:$4 sm:$0xff]  }
 0x19d   : > { %3562 = vmatprep.subr.bf16.mxu0 %v5066_v10  ;;  %v4515_v10 = vpack.c.bf16 %v803_v58, %v803_v58  ;;  %v5142_v58 = vld [vmem:[#allocation7 + $0xa70] ss:$8 sps:$4 sm:$0xff]  }
 0x19f   : > { %3317 = vmatpush1.bf16.msra.mxu1 %v5061_v13  ;;  %v5105_v13 = vld [vmem:[#allocation7 + $0x414] ss:$8 sps:$4 sm:$0xff]  }
 0x1a0   : > { %3563 = vmatpush1.bf16.msra.mxu0 %v5064_v14  ;;  %3318 = vmatprep.subr.bf16.mxu1 %v5069_v17  ;;  %v5103_v17 = vld [vmem:[#allocation7 + $0x410] ss:$8 sps:$4 sm:$0xff]  }
 0x1a1   : > { %3564 = vmatprep.subr.bf16.mxu0 %v5072_v19  ;;  %v4518_v19 = vpack.c.bf16 %v806_v6, %v806_v6  ;;  %v5153_v6 = vld [vmem:[#allocation7 + $0x494] ss:$8 sps:$4 sm:$0xff]  }
 0x1a3   : > { %3319 = vmatpush1.bf16.msra.mxu1 %v5067_v22  ;;  %v457_v22 = vadd.s32 %v5831_v15, %v431_v12  ;;  %v5151_v12 = vld [vmem:[#allocation7 + $0x490] ss:$8 sps:$4 sm:$0xff]  }
 0x1a4   : > { %3565 = vmatpush1.bf16.msra.mxu0 %v5070_v23  ;;  %3320 = vmatprep.subr.bf16.mxu1 %v5075_v25  ;;  %v5111_v23 = vld [vmem:[#allocation7 + $0x424] ss:$8 sps:$4 sm:$0xff]   ;;  %v443_v25 = vadd.s32 %v5827_v8, %v417_v20 }
 0x1a5   : > { %3566 = vmatprep.subr.bf16.mxu0 %v5078_v27  ;;  %v5112_v27 = vld [vmem:[#allocation7 + $0xa20] ss:$8 sps:$4 sm:$0xff]   ;;  %v4009_v28 = vshrl.u32 %v457_v22, 16 }
 0x1a7   : > { %3321 = vmatpush1.bf16.msra.mxu1 %v5073_v29  ;;  %v5117_v29 = vld [vmem:[#allocation7 + $0x434] ss:$8 sps:$4 sm:$0xff]  }
 0x1a8   : > { %3567 = vmatpush1.bf16.msra.mxu0 %v5076_v31  ;;  %3322 = vmatprep.subr.bf16.mxu1 %v5081_v33  ;;  %v469_v31 = vadd.s32 %v5831_v15, %v443_v25  ;;  %v6053_v33 = vxor.u32 %v4009_v28, %v457_v22  ;;  %v5160_v22 = vld [vmem:[#allocation7 + $0xaa0] ss:$8 sps:$4 sm:$0xff]   ;;  %v5168_v25 = vld [vmem:[#allocation7 + $0xab4] ss:$8 sps:$4 sm:$0xff]  }
 0x1a9   : > { %3568 = vmatprep.subr.bf16.mxu0 %v5084_v35  ;;  %v5123_v35 = vld [vmem:[#allocation7 + $0x444] ss:$8 sps:$4 sm:$0xff]  }
 0x1aa   : > { %v4021_v37 = vshrl.u32 %v469_v31, 16 }
 0x1ab   : > { %3323 = vmatpush1.bf16.msra.mxu1 %v5079_v38  ;;  %v5121_v38 = vld [vmem:[#allocation7 + $0x440] ss:$8 sps:$4 sm:$0xff]  }
 0x1ac   : > { %3569 = vmatpush1.bf16.msra.mxu0 %v5082_v39  ;;  %3324 = vmatprep.subr.bf16.mxu1 %v5087_v41  ;;  %v553_v39 = vmul.u32 2246822507, %v6053_v33  ;;  %v420_v41 = vadd.s32 2944, %v5822_v4  ;;  %v5174_v33 = vld [vmem:[#allocation7 + $0xac4] ss:$8 sps:$4 sm:$0xff]  }
 0x1ad   : > { %3570 = vmatprep.subr.bf16.mxu0 %v5090_v43  ;;  %v5129_v43 = vld [vmem:[#allocation7 + $0x454] ss:$8 sps:$4 sm:$0xff]  }
 0x1ae   : > { %v446_v48 = vadd.s32 %v5827_v8, %v420_v41  ;;  %v5180_v41 = vld [vmem:[#allocation7 + $0xad4] ss:$8 sps:$4 sm:$0xff]  }
 0x1af   : > { %3325 = vmatpush1.bf16.msra.mxu1 %v5085_v45  ;;  %v5127_v45 = vld [vmem:[#allocation7 + $0x450] ss:$8 sps:$4 sm:$0xff]  }
 0x1b0   : > { %3571 = vmatpush1.bf16.msra.mxu0 %v5088_v46  ;;  %3326 = vmatprep.subr.bf16.mxu1 %v5093_v50  ;;  %v5130_v46 = vld [vmem:[#allocation7 + $0xa50] ss:$8 sps:$4 sm:$0xff]   ;;  %v5138_v50 = vld [vmem:[#allocation7 + $0xa64] ss:$8 sps:$4 sm:$0xff]   ;;  %v472_v54 = vadd.s32 %v5831_v15, %v446_v48 }
 0x1b1   : > { %3572 = vmatprep.subr.bf16.mxu0 %v5096_v53  ;;  %v460_v53 = vadd.s32 %v5831_v15, %v434_v47  ;;  %v5183_v48 = vld [vmem:[#allocation7 + $0x4e4] ss:$8 sps:$4 sm:$0xff]  }
 0x1b2   : > { %v4024_v62 = vshrl.u32 %v472_v54, 16 }
 0x1b3   : > { %3327 = vmatpush1.bf16.msra.mxu1 %v5091_v55  ;;  %v5141_v55 = vld [vmem:[#allocation7 + $0x474] ss:$8 sps:$4 sm:$0xff]   ;;  %v4012_v61 = vshrl.u32 %v460_v53, 16 }
 0x1b4   : > { %3573 = vmatpush1.bf16.msra.mxu0 %v5094_v56  ;;  %3337 = vmatprep.subr.bf16.mxu1 %v5099_v63  ;;  %v5144_v56 = vld [vmem:[#allocation7 + $0xa74] ss:$8 sps:$4 sm:$0xff]   ;;  %v541_v63 = vxor.u32 %v4021_v37, %v469_v31  ;;  %v544_v5 = vxor.u32 %v4024_v62, %v472_v54  ;;  %v5169_v37 = vld [vmem:[#allocation7 + $0x4c0] ss:$8 sps:$4 sm:$0xff]  }
 0x1b5   : > { %3583 = vmatprep.subr.bf16.mxu0 %v5102_v1  ;;  %v532_v0 = vxor.u32 %v4012_v61, %v460_v53  ;;  %v5145_v1 = vld [vmem:[#allocation7 + $0x480] ss:$8 sps:$4 sm:$0xff]  }
 0x1b6   : > { %4480 = vmatmul.mubr.msk.bf16.vlgmr.msra.gmra.mrb[0].mxu1 %vm4478_vm14, %v4479_v9  ;;  %v565_v9 = vmul.u32 2246822507, %v541_v63  ;;  %v568_v14 = vmul.u32 2246822507, %v544_v5  ;;  %v5181_v54 = vld [vmem:[#allocation7 + $0x4e0] ss:$8 sps:$4 sm:$0xff]  }
 0x1b7   : > { %4516 = vmatmul.mubr.msk.bf16.vlgmr.msra.gmra.mrb[0].mxu0 %vm4514_vm15, %v4515_v10  ;;  %3338 = vmatpush1.bf16.msra.mxu1 %v5097_v2  ;;  %v5148_v2 = vld [vmem:[#allocation7 + $0xa80] ss:$8 sps:$4 sm:$0xff]   ;;  %v4033_v10 = vshrl.u32 %v553_v39, 13  ;;  %v556_v11 = vmul.u32 2246822507, %v532_v0  ;;  %v378_v0 = vld [vmem:[%s5801_s18 + $0x58] sm:$0xff] }
 0x1b8   : > { %3584 = vmatpush1.bf16.msra.mxu0 %v5100_v7  ;;  %3339 = vmatprep.subr.bf16.mxu1 %v5105_v13  ;;  %v5156_v7 = vld [vmem:[#allocation7 + $0xa94] ss:$8 sps:$4 sm:$0xff]   ;;  %v5154_v13 = vld [vmem:[#allocation7 + $0xa90] ss:$8 sps:$4 sm:$0xff]   ;;  %v5244_v61 = vld [vmem:[#allocation7 + $0xb80] ss:$8 sps:$4 sm:$0xff]  }
 0x1b9   : > { %3585 = vmatprep.subr.bf16.mxu0 %v5108_v16  ;;  %4483 = vmatprep.mubr.msk.bf16.mxu1 %vm4481_vm2, %v4482_v18  ;;  %v5159_v16 = vld [vmem:[#allocation7 + $0x4a4] ss:$8 sps:$4 sm:$0xff]   ;;  %v4045_v18 = vshrl.u32 %v565_v9, 13  ;;  %v4036_v20 = vshrl.u32 %v556_v11, 13  ;;  %v5187_v5 = vld [vmem:[#allocation7 + $0x4f0] ss:$8 sps:$4 sm:$0xff]  }
 0x1ba   : > { %4519 = vmatprep.mubr.msk.bf16.mxu0 %vm4517_vm3, %v4518_v19  ;;  %v625_v19 = vxor.u32 %v4033_v10, %v553_v39  ;;  %v5198_v10 = vld [vmem:[#allocation7 + $0xb04] ss:$8 sps:$4 sm:$0xff]  }
 0x1bb   : > { %3340 = vmatpush1.bf16.msra.mxu1 %v5103_v17  ;;  %v5162_v17 = vld [vmem:[#allocation7 + $0xaa4] ss:$8 sps:$4 sm:$0xff]   ;;  %v628_v28 = vxor.u32 %v4036_v20, %v556_v11  ;;  %v5253_v11 = vld [vmem:[#allocation7 + $0x5a0] ss:$8 sps:$4 sm:$0xff]  }
 0x1bc   : > { %3586 = vmatpush1.bf16.msra.mxu0 %v5106_v21  ;;  %3341 = vmatprep.subr.bf16.mxu1 %v5111_v23  ;;  %v5157_v21 = vld [vmem:[#allocation7 + $0x4a0] ss:$8 sps:$4 sm:$0xff]   ;;  %v4048_v23 = vshrl.u32 %v568_v14, 13 }
 0x1bd   : > { %3587 = vmatprep.subr.bf16.mxu0 %v5114_v24  ;;  %v5165_v24 = vld [vmem:[#allocation7 + $0x4b4] ss:$8 sps:$4 sm:$0xff]  }
 0x1be   : > { %v640_v31 = vxor.u32 %v4048_v23, %v568_v14 }
 0x1bf   : > { %3342 = vmatpush1.bf16.msra.mxu1 %v5109_v26  ;;  %v637_v26 = vxor.u32 %v4045_v18, %v565_v9  ;;  %v5195_v9 = vld [vmem:[#allocation7 + $0x504] ss:$8 sps:$4 sm:$0xff]   ;;  %v5193_v18 = vld [vmem:[#allocation7 + $0x500] ss:$8 sps:$4 sm:$0xff]  }
 0x1c0   : > { %3588 = vmatpush1.bf16.msra.mxu0 %v5112_v27  ;;  %3343 = vmatprep.subr.bf16.mxu1 %v5117_v29  ;;  %v649_v27 = vmul.u32 3266489909, %v625_v19  ;;  %v5163_v29 = vld [vmem:[#allocation7 + $0x4b0] ss:$8 sps:$4 sm:$0xff]   ;;  %v664_v39 = vmul.u32 3266489909, %v640_v31 }
 0x1c1   : > { %3589 = vmatprep.subr.bf16.mxu0 %v5120_v30  ;;  %v5166_v30 = vld [vmem:[#allocation7 + $0xab0] ss:$8 sps:$4 sm:$0xff]   ;;  %v5196_v19 = vld [vmem:[#allocation7 + $0xb00] ss:$8 sps:$4 sm:$0xff]   ;;  %v5213_v31 = vld [vmem:[#allocation7 + $0x534] ss:$8 sps:$4 sm:$0xff]  }
 0x1c2   : > { %v4072_v47 = vshrl.u32 %v664_v39, 16 }
 0x1c3   : > { %3344 = vmatpush1.bf16.msra.mxu1 %v5115_v32  ;;  %v5171_v32 = vld [vmem:[#allocation7 + $0x4c4] ss:$8 sps:$4 sm:$0xff]  }
 0x1c4   : > { %3590 = vmatpush1.bf16.msra.mxu0 %v5118_v34  ;;  %3345 = vmatprep.subr.bf16.mxu1 %v5123_v35  ;;  %v661_v34 = vmul.u32 3266489909, %v637_v26  ;;  %v4057_v35 = vshrl.u32 %v649_v27, 16  ;;  %v5202_v26 = vld [vmem:[#allocation7 + $0xb10] ss:$8 sps:$4 sm:$0xff]  }
 0x1c5   : > { %3591 = vmatprep.subr.bf16.mxu0 %v5126_v36  ;;  %v652_v36 = vmul.u32 3266489909, %v628_v28  ;;  %v5210_v28 = vld [vmem:[#allocation7 + $0xb24] ss:$8 sps:$4 sm:$0xff]  }
 0x1c7   : > { %3346 = vmatpush1.bf16.msra.mxu1 %v5121_v38  ;;  %v5172_v38 = vld [vmem:[#allocation7 + $0xac0] ss:$8 sps:$4 sm:$0xff]  }
 0x1c8   : > { %3592 = vmatpush1.bf16.msra.mxu0 %v5124_v42  ;;  %3347 = vmatprep.subr.bf16.mxu1 %v5129_v43  ;;  %v4069_v42 = vshrl.u32 %v661_v34, 16  ;;  %v721_v43 = vxor.u32 %v4057_v35, %v649_v27  ;;  %v5207_v27 = vld [vmem:[#allocation7 + $0x524] ss:$8 sps:$4 sm:$0xff]   ;;  %v407_v35 = vadd.s32 1280, %v5822_v4 }
 0x1c9   : > { %3593 = vmatprep.subr.bf16.mxu0 %v5132_v44  ;;  %v4060_v44 = vshrl.u32 %v652_v36, 16 }
 0x1cb   : > { %3348 = vmatpush1.bf16.msra.mxu1 %v5127_v45  ;;  %v5175_v45 = vld [vmem:[#allocation7 + $0x4d0] ss:$8 sps:$4 sm:$0xff]   ;;  %v724_v53 = vxor.u32 %v4060_v44, %v652_v36  ;;  %v5219_v36 = vld [vmem:[#allocation7 + $0x544] ss:$8 sps:$4 sm:$0xff]  }
 0x1cc   : > { %3594 = vmatpush1.bf16.msra.mxu0 %v5130_v46  ;;  %3349 = vmatprep.subr.bf16.mxu1 %v5135_v49  ;;  %v5178_v46 = vld [vmem:[#allocation7 + $0xad0] ss:$8 sps:$4 sm:$0xff]   ;;  %v5186_v49 = vld [vmem:[#allocation7 + $0xae4] ss:$8 sps:$4 sm:$0xff]  }
 0x1cd   : > { %3595 = vmatprep.subr.bf16.mxu0 %v5138_v50  ;;  %v733_v50 = vxor.u32 %v4069_v42, %v661_v34  ;;  %v5214_v34 = vld [vmem:[#allocation7 + $0xb30] ss:$8 sps:$4 sm:$0xff]   ;;  %v5225_v42 = vld [vmem:[#allocation7 + $0x554] ss:$8 sps:$4 sm:$0xff]  }
 0x1cf   : > { %3350 = vmatpush1.bf16.msra.mxu1 %v5133_v51  ;;  %v745_v51 = vand.u32 16777215, %v721_v43  ;;  %v5228_v43 = vld [vmem:[#allocation7 + $0xb54] ss:$8 sps:$4 sm:$0xff]  }
 0x1d0   : > { %3596 = vmatpush1.bf16.msra.mxu0 %v5136_v52  ;;  %3351 = vmatprep.subr.bf16.mxu1 %v5141_v55  ;;  %v375_v52 = vld [vmem:[%s5801_s18 + $0x40] sm:$0xff] }
 0x1d1   : > { %3597 = vmatprep.subr.bf16.mxu0 %v5144_v56  ;;  %v5184_v55 = vld [vmem:[#allocation7 + $0xae0] ss:$8 sps:$4 sm:$0xff]   ;;  %vm6068_vm4 = vcmp.lt.s32.totalorder %v745_v51, 5033164  ;;  %v793_v62 = vmul.f32 3.3333333, %v375_v52 }
 0x1d2   : > { %v387_v56 = vld [vmem:[%s5801_s18 + $0xa0] sm:$0xff]  ;;  %vm4484_vm6 = vmpackc.low %vm6068_vm4, %vm6068_vm4 }
 0x1d3   : > { %3352 = vmatpush1.bf16.msra.mxu1 %v5139_v57  ;;  %v736_v57 = vxor.u32 %v4072_v47, %v664_v39  ;;  %v805_v63 = vmul.f32 3.3333333, %v387_v56  ;;  %v4485_v14 = vpack.c.bf16 %v793_v62, %v793_v62  ;;  %v5217_v39 = vld [vmem:[#allocation7 + $0x540] ss:$8 sps:$4 sm:$0xff]   ;;  %v5238_v56 = vld [vmem:[#allocation7 + $0xb70] ss:$8 sps:$4 sm:$0xff]  }
 0x1d4   : > { %3598 = vmatpush1.bf16.msra.mxu0 %v5142_v58  ;;  %3353 = vmatprep.subr.bf16.mxu1 %v5147_v59  ;;  %v5189_v58 = vld [vmem:[#allocation7 + $0x4f4] ss:$8 sps:$4 sm:$0xff]   ;;  %v5232_v51 = vld [vmem:[#allocation7 + $0xb60] ss:$8 sps:$4 sm:$0xff]  }
 0x1d5   : > { %3599 = vmatprep.subr.bf16.mxu0 %v5150_v60  ;;  %v5192_v59 = vld [vmem:[#allocation7 + $0xaf4] ss:$8 sps:$4 sm:$0xff]   ;;  %v757_v60 = vand.u32 16777215, %v733_v50  ;;  %v5229_v50 = vld [vmem:[#allocation7 + $0x560] ss:$8 sps:$4 sm:$0xff]  }
 0x1d7   : > { %3354 = vmatpush1.bf16.msra.mxu1 %v5145_v1  ;;  %v748_v1 = vand.u32 16777215, %v724_v53  ;;  %vm6074_vm5 = vcmp.lt.s32.totalorder %v757_v60, 5033164  ;;  %v5240_v53 = vld [vmem:[#allocation7 + $0xb74] ss:$8 sps:$4 sm:$0xff]  }
 0x1d8   : > { %3600 = vmatpush1.bf16.msra.mxu0 %v5148_v2  ;;  %3355 = vmatprep.subr.bf16.mxu1 %v5153_v6  ;;  %v390_v2 = vld [vmem:[%s5801_s18 + $0xb8] sm:$0xff]  ;;  %vm4520_vm8 = vmpackc.low %vm6074_vm5, %vm6074_vm5  ;;  %v5241_v60 = vld [vmem:[#allocation7 + $0x580] ss:$8 sps:$4 sm:$0xff]  }
 0x1d9   : > { %3601 = vmatprep.subr.bf16.mxu0 %v5156_v7  ;;  %v5190_v6 = vld [vmem:[#allocation7 + $0xaf0] ss:$8 sps:$4 sm:$0xff]   ;;  %v760_v7 = vand.u32 16777215, %v736_v57  ;;  %vm6081_vm7 = vcmp.lt.s32.totalorder %v748_v1, 5033164 }
 0x1da   : > { %vm4487_vm10 = vmpackc.low %vm6081_vm7, %vm6081_vm7 }
 0x1db   : > { %3356 = vmatpush1.bf16.msra.mxu1 %v5151_v12  ;;  %v796_v12 = vmul.f32 3.3333333, %v378_v0  ;;  %vm6088_vm9 = vcmp.lt.s32.totalorder %v760_v7, 5033164  ;;  %v5252_v0 = vld [vmem:[#allocation7 + $0xb94] ss:$8 sps:$4 sm:$0xff]  }
 0x1dc   : > { %3602 = vmatpush1.bf16.msra.mxu0 %v5154_v13  ;;  %3357 = vmatprep.subr.bf16.mxu1 %v5159_v16  ;;  %v808_v13 = vmul.f32 3.3333333, %v390_v2  ;;  %v4521_v16 = vpack.c.bf16 %v805_v63, %v805_v63  ;;  %vm4523_vm11 = vmpackc.low %vm6088_vm9, %vm6088_vm9  ;;  %v5249_v63 = vld [vmem:[#allocation7 + $0x594] ss:$8 sps:$4 sm:$0xff]   ;;  %v5247_v2 = vld [vmem:[#allocation7 + $0x590] ss:$8 sps:$4 sm:$0xff]  }
 0x1dd   : > { %3603 = vmatprep.subr.bf16.mxu0 %v5162_v17  ;;  %v4488_v23 = vpack.c.bf16 %v796_v12, %v796_v12  ;;  %v5255_v7 = vld [vmem:[#allocation7 + $0x5a4] ss:$8 sps:$4 sm:$0xff]   ;;  %v5256_v12 = vld [vmem:[#allocation7 + $0xba0] ss:$8 sps:$4 sm:$0xff]  }
 0x1df   : > { %3358 = vmatpush1.bf16.msra.mxu1 %v5157_v21  ;;  %v5201_v21 = vld [vmem:[#allocation7 + $0x514] ss:$8 sps:$4 sm:$0xff]  }
 0x1e0   : > { %3604 = vmatpush1.bf16.msra.mxu0 %v5160_v22  ;;  %3359 = vmatprep.subr.bf16.mxu1 %v5165_v24  ;;  %v5204_v22 = vld [vmem:[#allocation7 + $0xb14] ss:$8 sps:$4 sm:$0xff]   ;;  %v4524_v24 = vpack.c.bf16 %v808_v13, %v808_v13 }
 0x1e1   : > { %3605 = vmatprep.subr.bf16.mxu0 %v5168_v25  ;;  %v5199_v25 = vld [vmem:[#allocation7 + $0x510] ss:$8 sps:$4 sm:$0xff]  }
 0x1e3   : > { %3360 = vmatpush1.bf16.msra.mxu1 %v5163_v29  ;;  %v5205_v29 = vld [vmem:[#allocation7 + $0x520] ss:$8 sps:$4 sm:$0xff]  }
 0x1e4   : > { %3606 = vmatpush1.bf16.msra.mxu0 %v5166_v30  ;;  %3361 = vmatprep.subr.bf16.mxu1 %v5171_v32  ;;  %v5208_v30 = vld [vmem:[#allocation7 + $0xb20] ss:$8 sps:$4 sm:$0xff]   ;;  %v5216_v32 = vld [vmem:[#allocation7 + $0xb34] ss:$8 sps:$4 sm:$0xff]  }
 0x1e5   : > { %3607 = vmatprep.subr.bf16.mxu0 %v5174_v33  ;;  %v5211_v33 = vld [vmem:[#allocation7 + $0x530] ss:$8 sps:$4 sm:$0xff]  }
 0x1e7   : > { %3362 = vmatpush1.bf16.msra.mxu1 %v5169_v37  ;;  %v5222_v37 = vld [vmem:[#allocation7 + $0xb44] ss:$8 sps:$4 sm:$0xff]  }
 0x1e8   : > { %3608 = vmatpush1.bf16.msra.mxu0 %v5172_v38  ;;  %3363 = vmatprep.subr.bf16.mxu1 %v5177_v40  ;;  %v419_v38 = vadd.s32 2816, %v5822_v4  ;;  %v5220_v40 = vld [vmem:[#allocation7 + $0xb40] ss:$8 sps:$4 sm:$0xff]   ;;  %v5231_v4 = vld [vmem:[#allocation7 + $0x564] ss:$8 sps:$4 sm:$0xff]  }
 0x1e9   : > { %3609 = vmatprep.subr.bf16.mxu0 %v5180_v41  ;;  %v433_v41 = vadd.s32 %v5827_v8, %v407_v35 }
 0x1ea   : > { %v445_v44 = vadd.s32 %v5827_v8, %v419_v38  ;;  %v5237_v8 = vld [vmem:[#allocation7 + $0x574] ss:$8 sps:$4 sm:$0xff]  }
 0x1eb   : > { %3364 = vmatpush1.bf16.msra.mxu1 %v5175_v45  ;;  %v5223_v45 = vld [vmem:[#allocation7 + $0x550] ss:$8 sps:$4 sm:$0xff]   ;;  %v459_v47 = vadd.s32 %v5831_v15, %v433_v41  ;;  %v5285_v41 = vld [vmem:[#allocation7 + $0x5f4] ss:$8 sps:$4 sm:$0xff]  }
 0x1ec   : > { %3610 = vmatpush1.bf16.msra.mxu0 %v5178_v46  ;;  %3365 = vmatprep.subr.bf16.mxu1 %v5183_v48  ;;  %v5226_v46 = vld [vmem:[#allocation7 + $0xb50] ss:$8 sps:$4 sm:$0xff]   ;;  %v5234_v48 = vld [vmem:[#allocation7 + $0xb64] ss:$8 sps:$4 sm:$0xff]  }
 0x1ed   : > { %3611 = vmatprep.subr.bf16.mxu0 %v5186_v49  ;;  %v471_v49 = vadd.s32 %v5831_v15, %v445_v44  ;;  %v4011_v52 = vshrl.u32 %v459_v47, 16  ;;  %v377_v38 = vld [vmem:[%s5801_s18 + $0x50] sm:$0xff] }
 0x1ee   : > { %v795_v44 = vmul.f32 3.3333333, %v377_v38 }
 0x1ef   : > { %3366 = vmatpush1.bf16.msra.mxu1 %v5181_v54  ;;  %v4023_v54 = vshrl.u32 %v471_v49, 16  ;;  %v531_v57 = vxor.u32 %v4011_v52, %v459_v47  ;;  %v5286_v47 = vld [vmem:[#allocation7 + $0xbf0] ss:$8 sps:$4 sm:$0xff]  }
 0x1f0   : > { %3612 = vmatpush1.bf16.msra.mxu0 %v5184_v55  ;;  %3367 = vmatprep.subr.bf16.mxu1 %v5189_v58  ;;  %v5235_v55 = vld [vmem:[#allocation7 + $0x570] ss:$8 sps:$4 sm:$0xff]   ;;  %v5243_v58 = vld [vmem:[#allocation7 + $0x584] ss:$8 sps:$4 sm:$0xff]  }
 0x1f1   : > { %3613 = vmatprep.subr.bf16.mxu0 %v5192_v59  ;;  %v5246_v59 = vld [vmem:[#allocation7 + $0xb84] ss:$8 sps:$4 sm:$0xff]   ;;  %v543_v15 = vxor.u32 %v4023_v54, %v471_v49  ;;  %v555_v62 = vmul.u32 2246822507, %v531_v57  ;;  %v5295_v54 = vld [vmem:[#allocation10 + $0x58] sm:$0xff]  }
 0x1f2   : > { %v5292_v52 = vld [vmem:[#allocation10 + $0x8] sm:$0xff]   ;;  %v5298_v57 = vld [vmem:[#allocation10 + $0x20] sm:$0xff]  }
 0x1f3   : > { %3368 = vmatpush1.bf16.msra.mxu1 %v5187_v5  ;;  %v567_v1 = vmul.u32 2246822507, %v543_v15  ;;  %v5250_v5 = vld [vmem:[#allocation7 + $0xb90] ss:$8 sps:$4 sm:$0xff]  }
 0x1f4   : > { %3614 = vmatpush1.bf16.msra.mxu0 %v5190_v6  ;;  %3378 = vmatprep.subr.bf16.mxu1 %v5195_v9  ;;  %v4035_v6 = vshrl.u32 %v555_v62, 13  ;;  %v5258_v9 = vld [vmem:[#allocation7 + $0xba4] ss:$8 sps:$4 sm:$0xff]   ;;  %v5301_v15 = vld [vmem:[#allocation10 + $0x70] sm:$0xff]  }
 0x1f5   : > { %3624 = vmatprep.subr.bf16.mxu0 %v5198_v10  ;;  %v4047_v10 = vshrl.u32 %v567_v1, 13 }
 0x1f6   : > { %4486 = vmatmul.mubr.msk.bf16.vlgmr.msra.gmra.mrb[0].mxu1 %vm4484_vm6, %v4485_v14  ;;  %v627_v13 = vxor.u32 %v4035_v6, %v555_v62  ;;  %v5261_v14 = vld [vmem:[#allocation7 + $0x5b4] ss:$8 sps:$4 sm:$0xff]  }
 0x1f7   : > { %4522 = vmatmul.mubr.msk.bf16.vlgmr.msra.gmra.mrb[0].mxu0 %vm4520_vm8, %v4521_v16  ;;  %3379 = vmatpush1.bf16.msra.mxu1 %v5193_v18  ;;  %v5264_v16 = vld [vmem:[#allocation7 + $0xbb4] ss:$8 sps:$4 sm:$0xff]   ;;  %v639_v17 = vxor.u32 %v4047_v10, %v567_v1  ;;  %v5259_v18 = vld [vmem:[#allocation7 + $0x5b0] ss:$8 sps:$4 sm:$0xff]   ;;  %v1249_v1 = vsub.s32 1, %v5820_v3 }
 0x1f8   : > { %3625 = vmatpush1.bf16.msra.mxu0 %v5196_v19  ;;  %3380 = vmatprep.subr.bf16.mxu1 %v5201_v21  ;;  %v5262_v19 = vld [vmem:[#allocation7 + $0xbb0] ss:$8 sps:$4 sm:$0xff]   ;;  %v651_v20 = vmul.u32 3266489909, %v627_v13  ;;  %v5267_v21 = vld [vmem:[#allocation7 + $0x5c4] ss:$8 sps:$4 sm:$0xff]  }
 0x1f9   : > { %3626 = vmatprep.subr.bf16.mxu0 %v5204_v22  ;;  %4489 = vmatprep.mubr.msk.bf16.mxu1 %vm4487_vm10, %v4488_v23  ;;  %v5270_v22 = vld [vmem:[#allocation7 + $0xbc4] ss:$8 sps:$4 sm:$0xff]   ;;  %v663_v23 = vmul.u32 3266489909, %v639_v17  ;;  %v5304_v62 = vld [vmem:[#allocation10 + $0x38] sm:$0xff]  }
 0x1fa   : > { %4525 = vmatprep.mubr.msk.bf16.mxu0 %vm4523_vm11, %v4524_v24  ;;  %v5265_v24 = vld [vmem:[#allocation7 + $0x5c0] ss:$8 sps:$4 sm:$0xff]  }
 0x1fb   : > { %3381 = vmatpush1.bf16.msra.mxu1 %v5199_v25  ;;  %v5268_v25 = vld [vmem:[#allocation7 + $0xbc0] ss:$8 sps:$4 sm:$0xff]  }
 0x1fc   : > { %3627 = vmatpush1.bf16.msra.mxu0 %v5202_v26  ;;  %3382 = vmatprep.subr.bf16.mxu1 %v5207_v27  ;;  %v4059_v26 = vshrl.u32 %v651_v20, 16  ;;  %v5273_v27 = vld [vmem:[#allocation7 + $0x5d4] ss:$8 sps:$4 sm:$0xff]  }
 0x1fd   : > { %3628 = vmatprep.subr.bf16.mxu0 %v5210_v28  ;;  %v5276_v28 = vld [vmem:[#allocation7 + $0xbd4] ss:$8 sps:$4 sm:$0xff]  }
 0x1ff   : > { %3383 = vmatpush1.bf16.msra.mxu1 %v5205_v29  ;;  %v4071_v29 = vshrl.u32 %v663_v23, 16 }
 0x200   : > { %3629 = vmatpush1.bf16.msra.mxu0 %v5208_v30  ;;  %3384 = vmatprep.subr.bf16.mxu1 %v5213_v31  ;;  %v5271_v30 = vld [vmem:[#allocation7 + $0x5d0] ss:$8 sps:$4 sm:$0xff]  }
 0x201   : > { %3630 = vmatprep.subr.bf16.mxu0 %v5216_v32  ;;  %v5274_v31 = vld [vmem:[#allocation7 + $0xbd0] ss:$8 sps:$4 sm:$0xff]   ;;  %v723_v32 = vxor.u32 %v4059_v26, %v651_v20  ;;  %v735_v35 = vxor.u32 %v4071_v29, %v663_v23 }
 0x203   : > { %3385 = vmatpush1.bf16.msra.mxu1 %v5211_v33  ;;  %v5279_v33 = vld [vmem:[#allocation7 + $0x5e4] ss:$8 sps:$4 sm:$0xff]  }
 0x204   : > { %3631 = vmatpush1.bf16.msra.mxu0 %v5214_v34  ;;  %3386 = vmatprep.subr.bf16.mxu1 %v5219_v36  ;;  %v5282_v34 = vld [vmem:[#allocation7 + $0xbe4] ss:$8 sps:$4 sm:$0xff]   ;;  %v5277_v36 = vld [vmem:[#allocation7 + $0x5e0] ss:$8 sps:$4 sm:$0xff]  }
 0x205   : > { %3632 = vmatprep.subr.bf16.mxu0 %v5222_v37  ;;  %v5280_v37 = vld [vmem:[#allocation7 + $0xbe0] ss:$8 sps:$4 sm:$0xff]  }
 0x207   : > { %3387 = vmatpush1.bf16.msra.mxu1 %v5217_v39  ;;  %v747_v39 = vand.u32 16777215, %v723_v32 }
 0x208   : > { %3633 = vmatpush1.bf16.msra.mxu0 %v5220_v40  ;;  %3388 = vmatprep.subr.bf16.mxu1 %v5225_v42  ;;  %v389_v40 = vld [vmem:[%s5801_s18 + $0xb0] sm:$0xff] }
 0x209   : > { %3634 = vmatprep.subr.bf16.mxu0 %v5228_v43  ;;  %v5288_v42 = vld [vmem:[#allocation7 + $0xbf4] ss:$8 sps:$4 sm:$0xff]   ;;  %v759_v43 = vand.u32 16777215, %v735_v35  ;;  %vm771_vm12 = vcmp.lt.s32.totalorder %v747_v39, 5033164 }
 0x20a   : > { %vm4490_vm14 = vmpackc.low %vm771_vm12, %vm771_vm12 }
 0x20b   : > { %3389 = vmatpush1.bf16.msra.mxu1 %v5223_v45  ;;  %v807_v45 = vmul.f32 3.3333333, %v389_v40  ;;  %vm783_vm13 = vcmp.lt.s32.totalorder %v759_v43, 5033164 }
 0x20c   : > { %3635 = vmatpush1.bf16.msra.mxu0 %v5226_v46  ;;  %3390 = vmatprep.subr.bf16.mxu1 %v5231_v4  ;;  %v5283_v46 = vld [vmem:[#allocation7 + $0x5f0] ss:$8 sps:$4 sm:$0xff]   ;;  %v5289_v4 = vld [vmem:[#allocation10 + $0x40] sm:$0xff]   ;;  %vm4526_vm15 = vmpackc.low %vm783_vm13, %vm783_vm13 }
 0x20d   : > { %3636 = vmatprep.subr.bf16.mxu0 %v5234_v48  ;;  %v4491_v48 = vpack.c.bf16 %v795_v44, %v795_v44  ;;  %v4527_v49 = vpack.c.bf16 %v807_v45, %v807_v45 }
 0x20f   : > { %3391 = vmatpush1.bf16.msra.mxu1 %v5229_v50  ;;  %v5290_v50 = vld [vmem:[#allocation10] sm:$0xff]  }
 0x210   : > { %3637 = vmatpush1.bf16.msra.mxu0 %v5232_v51  ;;  %3392 = vmatprep.subr.bf16.mxu1 %v5237_v8  ;;  %v5291_v51 = vld [vmem:[#allocation10 + $0x48] sm:$0xff]   ;;  %v5293_v8 = vld [vmem:[#allocation10 + $0x50] sm:$0xff]  }
 0x211   : > { %3638 = vmatprep.subr.bf16.mxu0 %v5240_v53  ;;  %v5294_v53 = vld [vmem:[#allocation10 + $0x10] sm:$0xff]  }
 0x213   : > { %3393 = vmatpush1.bf16.msra.mxu1 %v5235_v55  ;;  %v5296_v55 = vld [vmem:[#allocation10 + $0x18] sm:$0xff]  }
 0x214   : > { %3639 = vmatpush1.bf16.msra.mxu0 %v5238_v56  ;;  %3394 = vmatprep.subr.bf16.mxu1 %v5243_v58  ;;  %v5297_v56 = vld [vmem:[#allocation10 + $0x60] sm:$0xff]   ;;  %v5299_v58 = vld [vmem:[#allocation10 + $0x68] sm:$0xff]  }
 0x215   : > { %3640 = vmatprep.subr.bf16.mxu0 %v5246_v59  ;;  %v5300_v59 = vld [vmem:[#allocation10 + $0x28] sm:$0xff]  }
 0x217   : > { %3395 = vmatpush1.bf16.msra.mxu1 %v5241_v60  ;;  %v5302_v60 = vld [vmem:[#allocation10 + $0x30] sm:$0xff]  }
 0x218   : > { %3641 = vmatpush1.bf16.msra.mxu0 %v5244_v61  ;;  %3396 = vmatprep.subr.bf16.mxu1 %v5249_v63  ;;  %v5303_v61 = vld [vmem:[#allocation10 + $0x78] sm:$0xff]   ;;  %v1245_v63 = vsub.s32 0, %v5820_v3 }
 0x219   : > { %3642 = vmatprep.subr.bf16.mxu0 %v5252_v0  ;;  %v1241_v0 = vld [vmem:[#allocation9] sm:$0x3] }
 0x21b   : > { %3397 = vmatpush1.bf16.msra.mxu1 %v5247_v2  ;;  %v1246_v2 = vrot.slane %v1241_v0, %v1245_v63 }
 0x21c   : > { %3643 = vmatpush1.bf16.msra.mxu0 %v5250_v5  ;;  %3398 = vmatprep.subr.bf16.mxu1 %v5255_v7  ;;  %v1250_v5 = vrot.slane %v1241_v0, %v1249_v1 }
 0x21d   : > { %3644 = vmatprep.subr.bf16.mxu0 %v5258_v9 }
 0x21f   : > { %3399 = vmatpush1.bf16.msra.mxu1 %v5253_v11 }
 0x220   : > { %3645 = vmatpush1.bf16.msra.mxu0 %v5256_v12  ;;  %3400 = vmatprep.subr.bf16.mxu1 %v5261_v14 }
 0x221   : > { %3646 = vmatprep.subr.bf16.mxu0 %v5264_v16 }
 0x223   : > { %3401 = vmatpush1.bf16.msra.mxu1 %v5259_v18 }
 0x224   : > { %3647 = vmatpush1.bf16.msra.mxu0 %v5262_v19  ;;  %3402 = vmatprep.subr.bf16.mxu1 %v5267_v21 }
 0x225   : > { %3648 = vmatprep.subr.bf16.mxu0 %v5270_v22 }
 0x227   : > { %3403 = vmatpush1.bf16.msra.mxu1 %v5265_v24 }
 0x228   : > { %3649 = vmatpush1.bf16.msra.mxu0 %v5268_v25  ;;  %3404 = vmatprep.subr.bf16.mxu1 %v5273_v27  ;;  %v4529_v25 = vld [vmem:[#allocation12] ss:$0 sm:$0xff] }
 0x229   : > { %3650 = vmatprep.subr.bf16.mxu0 %v5276_v28 }
 0x22b   : > { %3405 = vmatpush1.bf16.msra.mxu1 %v5271_v30  ;;  %v4546_v30 = vld [vmem:[#allocation13] ss:$0 sm:$0xff] }
 0x22c   : > { %3651 = vmatpush1.bf16.msra.mxu0 %v5274_v31  ;;  %3406 = vmatprep.subr.bf16.mxu1 %v5279_v33  ;;  %v4547_v33 = vld [vmem:[#allocation4] ss:$0 sm:$0xff] }
 0x22d   : > { %3652 = vmatprep.subr.bf16.mxu0 %v5282_v34 }
 0x22f   : > { %3407 = vmatpush1.bf16.msra.mxu1 %v5277_v36 }
 0x230   : > { %3653 = vmatpush1.bf16.msra.mxu0 %v5280_v37  ;;  %3408 = vmatprep.subr.bf16.mxu1 %v5285_v41 }
 0x231   : > { %3654 = vmatprep.subr.bf16.mxu0 %v5288_v42 }
 0x233   : > { %3409 = vmatpush1.bf16.msra.mxu1 %v5283_v46 }
 0x234   : > { %3655 = vmatpush1.bf16.msra.mxu0 %v5286_v47  ;;  %4550 = vmatprep.subr.bf16.mxu1 %v5289_v4 }
 0x236   : > { %4492 = vmatmul.mubr.msk.bf16.vlgmr.msra.gmra.mrb[0].mxu1 %vm4490_vm14, %v4491_v48 }
 0x237   : > { %4528 = vmatmul.mubr.msk.bf16.vlgmr.msra.gmra.mrb[0].mxu0 %vm4526_vm15, %v4527_v49  ;;  %4551 = vmatpush3.bf16.msra.mxu1 %v5290_v50 }
 0x238   : > { %4552 = vmatprep.subr.bf16.mxu1 %v5291_v51 }
 0x23b   : > { %4553 = vmatpush3.bf16.msra.mxu1 %v5292_v52 }
 0x23c   : > { %4554 = vmatprep.subr.bf16.mxu1 %v5293_v8 }
 0x23f   : > { %4555 = vmatpush3.bf16.msra.mxu1 %v5294_v53 }
 0x240   : > { %4556 = vmatprep.subr.bf16.mxu1 %v5295_v54 }
 0x243   : > { %4557 = vmatpush3.bf16.msra.mxu1 %v5296_v55 }
 0x244   : > { %4558 = vmatprep.subr.bf16.mxu1 %v5297_v56 }
 0x247   : > { %4559 = vmatpush3.bf16.msra.mxu1 %v5298_v57 }
 0x248   : > { %4560 = vmatprep.subr.bf16.mxu1 %v5299_v58 }
 0x24b   : > { %4561 = vmatpush3.bf16.msra.mxu1 %v5300_v59 }
 0x24c   : > { %4562 = vmatprep.subr.bf16.mxu1 %v5301_v15 }
 0x24f   : > { %4563 = vmatpush3.bf16.msra.mxu1 %v5302_v60 }
 0x250   : > { %4564 = vmatprep.subr.bf16.mxu1 %v5303_v61 }
 0x253   : > { %4565 = vmatpush3.bf16.msra.mxu1 %v5304_v62 }
 0x309   : > { %v3412_v6 = vpop.f32.mrb[0].mxu1 }
 0x30a   : > { %v3658_v7 = vpop.f32.mrb[0].mxu0  ;;  %v4572_v9 = vadd.f32 %v3412_v6, %v1246_v2  ;;  %v3414_v10 = vpop.f32.mrb[1].mxu1 }
 0x30b   : > { %v3660_v11 = vpop.f32.mrb[1].mxu0  ;;  %v4574_v12 = vadd.f32 %v3414_v10, %v1250_v5  ;;  %v3416_v13 = vpop.f32.mrb[2].mxu1 }
 0x30c   : > { %v3662_v14 = vpop.f32.mrb[2].mxu0  ;;  %v4573_v16 = vadd.f32 %v4572_v9, %v3658_v7  ;;  %v3417_v17 = vpop.f32.mrb[3].mxu1 }
 0x30d   : > { %v3663_v18 = vpop.f32.mrb[3].mxu0  ;;  %v4575_v19 = vadd.f32 %v4574_v12, %v3660_v11 }
 0x30e   : > { %v3665_v20 = vmax.f32 %v4573_v16, 0.0 }
 0x30f   : > { %v3666_v21 = vmax.f32 %v4575_v19, 0.0 }
 0x310   : > { %v3667_v23 = vpack.c.bf16 %v3665_v20, %v3665_v20 }
 0x311   : > { %v3668_v22 = vpack.c.bf16 %v3666_v21, %v3666_v21 }
 0x313   : > { %3836 = vmatprep.mubr.bf16.mxu1 %v3668_v22 }
 0x314   : > { %3837 = vmatmul.mubr.bf16.vlgmr.msra.gmra.mrb[4].mxu1 %v3667_v23 }
 0x3e7   : > { %v4566_v3 = vpop.f32.mrb[4].mxu1 }
 0x3e8   : > { %v4567_v24 = vpop.f32.mrb[5].mxu1 }
 0x3e9   : > { %v4568_v26 = vadd.f32 %v4567_v24, %v4566_v3  ;;  %v4569_v27 = vpop.f32.mrb[6].mxu1 }
 0x3ea   : > { %v4570_v28 = vpop.f32.mrb[7].mxu1 }
 0x3eb   : > { %v3839_v29 = vadd.f32 %v4568_v26, %v4529_v25 }
 0x3ed   : > { %v3844_v31 = vmax.f32 %v3839_v29, 0.0 }
 0x3ef   : > { %v3852_v32 = vmul.f32 %v4546_v30, %v3844_v31 }
 0x3f1   : > { %3853 = vadd.xlane.f32.xlu0 %v3852_v32 }
 0x47e   : > { %v3854_v34 = vpop.xlane.xlu0 %3853 }
 0x47f   : > { %v3862_v35 = vadd.f32 %v4547_v33, %v3854_v34 }
 0x481   : > { %v3863_v36 = vsub.f32 0.0, %v3862_v35 }
 0x483   : > { %v3864_v37 = vmul.f32 1.442695, %v3863_v36 }
 0x485   : > { %5305 = vpow2.f32 %v3864_v37 }
 0x48f   : > { %v5306_v38 = vpop.eup %5305 }
 0x490   : > { %v3866_v39 = vadd.f32 1.0, %v5306_v38 }
 0x492   : > { %5307 = vrcp.f32 %v3866_v39 }
 0x49c   : > { %v5308_v40 = vpop.eup %5307 }
 0x49d   : > { %3870 = vst.msk [vmem:[%s365_s20] sm:$0xff] %vm3869_vm0, %v5308_v40 }
 0x49e PF: > { %p24_p2 = scmp.ge.s32.totalorder %s5740_s25, 5   ;;  %s6199_s9 = smov %s5517_s10 }
 0x49f   : > { %s6200_s10 = smov %s5521_s11  ;;  %s6201_s11 = smov %s5751_s23 }
 0x4a0   : > { %s6202_s12 = smov %s5740_s25  ;;  %26 = sbr.rel (!%p24_p2) target bundleno = 9 (0x9), region = 108 }
 0x4a7   :  { %3890 = vsyncpa [#allocation6], 1 }
 0x4a8   :  { %3892 = vsyncpa [#allocation6 + $0x1], 1 }
 0x4a9   :  { %3893 = vsyncpa [#allocation8], 1 }
 0x4aa   :  { %3894 = vsyncpa [#allocation11], 1 }
 0x4ab   :  { %3895 = vsyncpa [#allocation14], 1 }

</bundles_post_ra>
